<compile_context>
chip_gen: v7x
topology: tpu7x:2x2x1
jax: 0.10.0
libtpu: 0.0.40
codegen_flags: <defaults>
</compile_context>

<pallas_src>
import math
import functools

import jax
import jax.numpy as jnp
from jax.experimental import pallas as pl
from jax.experimental.pallas import tpu as pltpu


# ----------------------------- shared math helpers -----------------------------

def _layer_norm(x, a, b, eps=1e-6):
    # Annotated-transformer LayerNorm: unbiased std, eps added to std (not var).
    mean = jnp.mean(x, axis=-1, keepdims=True)
    var = jnp.sum((x - mean) ** 2, axis=-1, keepdims=True) / (x.shape[-1] - 1)
    std = jnp.sqrt(var)
    return a * (x - mean) / (std + eps) + b


# ----------------------------------------------------------------- the kernel --

def _decode_layer_kernel(head_num, causal,
                         x_ref, mem_ref, src_mask_ref, *rest):
    if causal:
        (w_sqkv_ref, w_cq_ref, w_ckv_ref, w_o_ref,
         w1_ref, w2_ref, bias_ref, out_ref) = rest
        dst_mask_ref = None
    else:
        (dst_mask_ref, w_sqkv_ref, w_cq_ref, w_ckv_ref, w_o_ref,
         w1_ref, w2_ref, bias_ref, out_ref) = rest

    B, Sm = src_mask_ref.shape
    D = x_ref.shape[1]
    S = x_ref.shape[0] // B
    H = head_num
    dk = D // H
    HID = w1_ref.shape[1]

    x = x_ref[...]                 # (B*S, D)  batch folded into sublane rows
    mem = mem_ref[...]             # (B*Sm, D)

    # ---- unpack the bias / LayerNorm slab (all slices start at lane 0) -------
    bias = bias_ref[...]
    b_sqkv = bias[0:1, 0:3 * D]
    b_cq = bias[1:2, 0:D]
    b_ckv = bias[2:3, 0:2 * D]
    b_so = bias[3:4, 0:D]
    b_co = bias[4:5, 0:D]
    b1 = bias[5:6, 0:HID]
    b2 = bias[6:7, 0:D]
    ln0_a, ln0_b = bias[7:8, 0:D], bias[8:9, 0:D]
    ln1_a, ln1_b = bias[9:10, 0:D], bias[10:11, 0:D]
    ln2_a, ln2_b = bias[11:12, 0:D], bias[12:13, 0:D]

    w_o = w_o_ref[...]             # (2D, D): rows [0:D]=self W_o, [D:2D]=cross W_o

    # ---- additive attention biases (0 keep / -1e9 masked) --------------------
    if causal:
        r = jax.lax.broadcasted_iota(jnp.int32, (S, S), 0)
        c = jax.lax.broadcasted_iota(jnp.int32, (S, S), 1)
        dst_bias = jnp.where(c <= r, 0.0, -1e9).astype(jnp.float32)[None]      # (1,S,S)
    else:
        dm = jnp.where(dst_mask_ref[...] > 0.5, 0.0, -1e9).astype(jnp.float32)  # (B,S,S)
        dst_bias = jnp.broadcast_to(dm[:, None], (B, H, S, S)).reshape(B * H, S, S)
    sm = jnp.where(src_mask_ref[...] > 0.5, 0.0, -1e9).astype(jnp.float32)       # (B,Sm)
    src_bias = jnp.broadcast_to(sm[:, None, None, :], (B, H, 1, Sm)).reshape(B * H, 1, Sm)

    # ---- helpers --------------------------------------------------------------
    def to_heads(slab, col0, L):
        # (B*L, >=col0+H*dk) -> (B*H, L, dk); batch-major then head.
        heads = [slab[:, col0 + h * dk: col0 + (h + 1) * dk].reshape(B, 1, L, dk)
                 for h in range(H)]
        return jnp.concatenate(heads, axis=1).reshape(B * H, L, dk)

    def from_heads(t, L):
        # (B*H, L, dk) -> (B*L, H*dk) -- cheap 8-lane concats at this size.
        t4 = t.reshape(B, H, L, dk)
        return jnp.concatenate([t4[:, h] for h in range(H)],
                               axis=-1).reshape(B * L, H * dk)

    def attention(q_slab, q_col, kv_slab, k_col, v_col, Lk, bias_bh, w_out, b_out):
        qh = to_heads(q_slab, q_col, S)     # 1/sqrt(dk) already folded into W_q/b_q
        kh = to_heads(kv_slab, k_col, Lk)
        vh = to_heads(kv_slab, v_col, Lk)
        s = jnp.einsum('bqf,bkf->bqk', qh, kh, preferred_element_type=jnp.float32)
        s = s + bias_bh
        m = jnp.max(s, axis=-1, keepdims=True)
        e = jnp.exp(s - m)
        p = e * pl.reciprocal(jnp.sum(e, axis=-1, keepdims=True), approx=True)
        # TODO(synk): attention-probability dropout omitted (identity in eval)
        ctx = jnp.einsum('bqk,bkf->bqf', p, vh, preferred_element_type=jnp.float32)
        ctx = from_heads(ctx, S)            # (B*S, D)
        return jnp.dot(ctx, w_out, preferred_element_type=jnp.float32) + b_out

    # ---- SubLayer 0: x + self_attention(LN(x), LN(x), LN(x), dst_mask) --------
    xn = _layer_norm(x, ln0_a, ln0_b)
    qkv = jnp.dot(xn, w_sqkv_ref[...], preferred_element_type=jnp.float32) + b_sqkv
    x = x + attention(qkv, 0, qkv, D, 2 * D, S, dst_bias, w_o[0:D], b_so)

    # ---- SubLayer 1: x + attention(LN(x), memory, memory, src_mask) -----------
    xn = _layer_norm(x, ln1_a, ln1_b)
    q = jnp.dot(xn, w_cq_ref[...], preferred_element_type=jnp.float32) + b_cq
    kv = jnp.dot(mem, w_ckv_ref[...], preferred_element_type=jnp.float32) + b_ckv
    x = x + attention(q, 0, kv, 0, D, Sm, src_bias, w_o[D:2 * D], b_co)

    # ---- SubLayer 2: x + FFN(LN(x));  FFN(y) = W2(relu(W1 y)) -----------------
    xn = _layer_norm(x, ln2_a, ln2_b)
    h1 = jnp.maximum(
        jnp.dot(xn, w1_ref[...], preferred_element_type=jnp.float32) + b1, 0.0)
    x = x + jnp.dot(h1, w2_ref[...], preferred_element_type=jnp.float32) + b2

    out_ref[...] = x.astype(out_ref.dtype)


# ----------------------------------------------------- load-time weight packing

def pack_decode_layer_params(weights, head_num):
    """One-time packing of the 26 DecodeLayer params into lane-dense 2D slabs.
    Call once at parameter-load time (outside the forward hot path).
    1/sqrt(d_k) is folded into the query weights / biases here."""
    (sq_w, sq_b, sk_w, sk_b, sv_w, sv_b, so_w, so_b,
     cq_w, cq_b, ck_w, ck_b, cv_w, cv_b, co_w, co_b,
     w1, b1, w2, b2,
     ln0_a, ln0_b, ln1_a, ln1_b, ln2_a, ln2_b) = weights
    D = sq_w.shape[0]
    HID = w1.shape[1]
    scale = 1.0 / math.sqrt(D // head_num)

    w_sqkv = jnp.concatenate([sq_w * scale, sk_w, sv_w], axis=1)   # (D, 3D)
    w_cq = cq_w * scale                                            # (D, D)
    w_ckv = jnp.concatenate([ck_w, cv_w], axis=1)                  # (D, 2D)
    w_o = jnp.concatenate([so_w, co_w], axis=0)                    # (2D, D)

    W = max(3 * D, 2 * D, HID)

    def row(v):
        v = v.reshape(1, -1)
        return jnp.pad(v, ((0, 0), (0, W - v.shape[1])))

    bias_rows = jnp.concatenate(
        [row(jnp.concatenate([sq_b * scale, sk_b, sv_b], axis=1)),  # 0: self qkv
         row(cq_b * scale),                                         # 1: cross q
         row(jnp.concatenate([ck_b, cv_b], axis=1)),                # 2: cross kv
         row(so_b), row(co_b),                                      # 3,4: out-proj
         row(b1), row(b2),                                          # 5,6: FFN
         row(ln0_a), row(ln0_b),                                    # 7,8
         row(ln1_a), row(ln1_b),                                    # 9,10
         row(ln2_a), row(ln2_b)],                                   # 11,12
        axis=0).astype(jnp.float32)                                 # (13, W)

    return (w_sqkv, w_cq, w_ckv, w_o, w1, w2, bias_rows)


# ------------------------------------------------------------------- wrapper ---

def _decode_layer_forward(x, memory, src_mask, dst_mask, packed,
                          head_num, causal_dst_mask):
    B, S, D = x.shape
    Sm = memory.shape[1]
    w_sqkv, w_cq, w_ckv, w_o, w1, w2, bias_rows = packed

    # Free layout plumbing outside the kernel: fold the batch into rows and
    # flatten the (B,1,Sm) padding mask.
    inputs = [x.reshape(B * S, D), memory.reshape(B * Sm, D),
              src_mask.reshape(B, Sm)]
    if not causal_dst_mask:
        inputs.append(dst_mask)                                     # (B, S, S)
    inputs += [w_sqkv, w_cq, w_ckv, w_o, w1, w2, bias_rows]

    kernel = functools.partial(_decode_layer_kernel, head_num, causal_dst_mask)
    out = pl.pallas_call(
        kernel,
        out_shape=jax.ShapeDtypeStruct((B * S, D), x.dtype),
        grid=(1,),                                    # single step: batch folded in
        in_specs=[pl.BlockSpec(a.shape, lambda i, _n=a.ndim: (0,) * _n)
                  for a in inputs],
        out_specs=pl.BlockSpec((B * S, D), lambda i: (0, 0)),
        compiler_params=pltpu.CompilerParams(dimension_semantics=("arbitrary",)),
    )(*inputs)
    return out.reshape(B, S, D)


decode_layer_forward = jax.jit(
    _decode_layer_forward, static_argnames=("head_num", "causal_dst_mask"))


# -------------------------------------------------------- pure-JAX reference ---

def _mha_ref(q_in, k_in, v_in, mask, wq, bq, wk, bk, wv, bv, wo, bo, head_num):
    d_model = q_in.shape[-1]
    d_k = d_model // head_num
    q = q_in @ wq + bq
    k = k_in @ wk + bk
    v = v_in @ wv + bv
    scale = 1.0 / math.sqrt(d_k)
    heads = []
    for h in range(head_num):
        qh = q[:, h * d_k:(h + 1) * d_k]
        kh = k[:, h * d_k:(h + 1) * d_k]
        vh = v[:, h * d_k:(h + 1) * d_k]
        s = (qh @ kh.T) * scale
        s = jnp.where(mask == 0, -1e9, s)
        p = jax.nn.softmax(s, axis=-1)
        heads.append(p @ vh)
    o = jnp.concatenate(heads, axis=-1)
    return o @ wo + bo


def decode_layer_reference(x, memory, src_mask, dst_mask, weights, head_num):
    (sq_w, sq_b, sk_w, sk_b, sv_w, sv_b, so_w, so_b,
     cq_w, cq_b, ck_w, ck_b, cv_w, cv_b, co_w, co_b,
     w1, b1, w2, b2,
     ln0_a, ln0_b, ln1_a, ln1_b, ln2_a, ln2_b) = weights

    def one(xb, mb, smb, dmb):
        xn = _layer_norm(xb, ln0_a, ln0_b)
        xb = xb + _mha_ref(xn, xn, xn, dmb,
                           sq_w, sq_b, sk_w, sk_b, sv_w, sv_b, so_w, so_b,
                           head_num)
        xn = _layer_norm(xb, ln1_a, ln1_b)
        xb = xb + _mha_ref(xn, mb, mb, smb,
                           cq_w, cq_b, ck_w, ck_b, cv_w, cv_b, co_w, co_b,
                           head_num)
        xn = _layer_norm(xb, ln2_a, ln2_b)
        h = jnp.maximum(xn @ w1 + b1, 0.0)
        return xb + h @ w2 + b2

    return jax.vmap(one)(x, memory, src_mask, dst_mask)


# ---------------------------------------------------------------------- main ---

if __name__ == "__main__":
    B, S, Sm = 2, 8, 8          # batch, tgt seq, src seq
    D = 32                      # embedding_dim == size
    H = 4                       # head_num
    HID = 64                    # hidden_num of the FFN

    key = jax.random.PRNGKey(0)
    ks = iter(jax.random.split(key, 64))

    def rnd(shape, scale=0.02):
        return (scale * jax.random.normal(next(ks), shape)).astype(jnp.float32)

    def mat(din, dout):   # nn.Linear weight, stored as (in, out) so y = x @ W + b
        return rnd((din, dout))

    def bias(d):
        return rnd((1, d), scale=0.01)

    weights = []
    # self-attention q/k/v/o
    for _ in range(4):
        weights += [mat(D, D), bias(D)]
    # cross-attention q/k/v/o
    for _ in range(4):
        weights += [mat(D, D), bias(D)]
    # feed-forward
    weights += [mat(D, HID), bias(HID), mat(HID, D), bias(D)]
    # three LayerNorms (a_2 = ones, b_2 = zeros)
    for _ in range(3):
        weights += [jnp.ones((1, D), jnp.float32), jnp.zeros((1, D), jnp.float32)]

    x = rnd((B, S, D), scale=1.0)
    memory = rnd((B, Sm, D), scale=1.0)

    # dst_mask: causal (no label leakage); src_mask: padding mask (batch 1 has 2 pads)
    dst_mask = jnp.tril(jnp.ones((S, S), jnp.float32))[None].repeat(B, axis=0)
    src_mask = jnp.ones((B, 1, Sm), jnp.float32)
    src_mask = src_mask.at[1, 0, Sm - 2:].set(0.0)

    # One-time, load-time packing of the parameters into lane-dense slabs.
    packed = pack_decode_layer_params(weights, H)

    # Optimized path: causal dst_mask generated in-kernel (no (B,S,S) stream).
    out_causal = decode_layer_forward(x, memory, src_mask, None, packed,
                                      head_num=H, causal_dst_mask=True)
    out_causal = jax.block_until_ready(out_causal)

    # General path: arbitrary dst_mask streamed from HBM (same semantics here).
    out_streamed = decode_layer_forward(x, memory, src_mask, dst_mask, packed,
                                        head_num=H, causal_dst_mask=False)
    out_streamed = jax.block_until_ready(out_streamed)

    ref = decode_layer_reference(x, memory, src_mask, dst_mask, weights, H)
    assert out_causal.shape == (B, S, D)
    assert out_streamed.shape == (B, S, D)
    # Tolerance accounts for the approximate EUP reciprocal in the softmax.
    assert jnp.allclose(out_causal, ref, rtol=2e-3, atol=2e-3), \
        "causal-path kernel mismatch vs reference"
    assert jnp.allclose(out_streamed, ref, rtol=2e-3, atol=2e-3), \
        "streamed-mask kernel mismatch vs reference"

    print("KERNEL_OK")
</pallas_src>

<mosaic_0001>
module attributes {stable_mosaic.version = 11 : i64} {
  func.func @_decode_layer_kernel(%arg0: i32, %arg1: memref<16x32xf32, #tpu.memory_space<vmem>>, %arg2: memref<16x32xf32, #tpu.memory_space<vmem>>, %arg3: memref<2x8xf32, #tpu.memory_space<vmem>>, %arg4: memref<32x96xf32, #tpu.memory_space<vmem>>, %arg5: memref<32x32xf32, #tpu.memory_space<vmem>>, %arg6: memref<32x64xf32, #tpu.memory_space<vmem>>, %arg7: memref<64x32xf32, #tpu.memory_space<vmem>>, %arg8: memref<32x64xf32, #tpu.memory_space<vmem>>, %arg9: memref<64x32xf32, #tpu.memory_space<vmem>>, %arg10: memref<13x96xf32, #tpu.memory_space<vmem>>, %arg11: memref<16x32xf32, #tpu.memory_space<vmem>>) attributes {dimension_semantics = [#tpu.dimension_semantics<arbitrary>], iteration_bounds = array<i64: 1>, scalar_prefetch = 0 : i64, scratch_operands = 0 : i64, tpu.core_type = #tpu.core_type<tc>, window_params = [{pipeline_mode = #tpu.pipeline_mode<synchronous>, transform_indices = @transform_0, window_bounds = array<i64: 16, 32>}, {pipeline_mode = #tpu.pipeline_mode<synchronous>, transform_indices = @transform_1, window_bounds = array<i64: 16, 32>}, {pipeline_mode = #tpu.pipeline_mode<synchronous>, transform_indices = @transform_2, window_bounds = array<i64: 2, 8>}, {pipeline_mode = #tpu.pipeline_mode<synchronous>, transform_indices = @transform_3, window_bounds = array<i64: 32, 96>}, {pipeline_mode = #tpu.pipeline_mode<synchronous>, transform_indices = @transform_4, window_bounds = array<i64: 32, 32>}, {pipeline_mode = #tpu.pipeline_mode<synchronous>, transform_indices = @transform_5, window_bounds = array<i64: 32, 64>}, {pipeline_mode = #tpu.pipeline_mode<synchronous>, transform_indices = @transform_6, window_bounds = array<i64: 64, 32>}, {pipeline_mode = #tpu.pipeline_mode<synchronous>, transform_indices = @transform_7, window_bounds = array<i64: 32, 64>}, {pipeline_mode = #tpu.pipeline_mode<synchronous>, transform_indices = @transform_8, window_bounds = array<i64: 64, 32>}, {pipeline_mode = #tpu.pipeline_mode<synchronous>, transform_indices = @transform_9, window_bounds = array<i64: 13, 96>}, {pipeline_mode = #tpu.pipeline_mode<synchronous>, transform_indices = @transform_10, window_bounds = array<i64: 16, 32>}]} {
    %c0 = arith.constant 0 : index
    %c0_0 = arith.constant 0 : index
    %0 = vector.load %arg1[%c0, %c0_0] : memref<16x32xf32, #tpu.memory_space<vmem>>, vector<16x32xf32>
    %c0_1 = arith.constant 0 : index
    %c0_2 = arith.constant 0 : index
    %1 = vector.load %arg2[%c0_1, %c0_2] : memref<16x32xf32, #tpu.memory_space<vmem>>, vector<16x32xf32>
    %c0_3 = arith.constant 0 : index
    %c0_4 = arith.constant 0 : index
    %2 = vector.load %arg10[%c0_3, %c0_4] : memref<13x96xf32, #tpu.memory_space<vmem>>, vector<13x96xf32>
    %3 = vector.extract_strided_slice %2 {offsets = [0, 0], sizes = [1, 96], strides = [1, 1]} : vector<13x96xf32> to vector<1x96xf32>
    %4 = vector.extract_strided_slice %2 {offsets = [1, 0], sizes = [1, 32], strides = [1, 1]} : vector<13x96xf32> to vector<1x32xf32>
    %5 = vector.extract_strided_slice %2 {offsets = [2, 0], sizes = [1, 64], strides = [1, 1]} : vector<13x96xf32> to vector<1x64xf32>
    %6 = vector.extract_strided_slice %2 {offsets = [3, 0], sizes = [1, 32], strides = [1, 1]} : vector<13x96xf32> to vector<1x32xf32>
    %7 = vector.extract_strided_slice %2 {offsets = [4, 0], sizes = [1, 32], strides = [1, 1]} : vector<13x96xf32> to vector<1x32xf32>
    %8 = vector.extract_strided_slice %2 {offsets = [5, 0], sizes = [1, 64], strides = [1, 1]} : vector<13x96xf32> to vector<1x64xf32>
    %9 = vector.extract_strided_slice %2 {offsets = [6, 0], sizes = [1, 32], strides = [1, 1]} : vector<13x96xf32> to vector<1x32xf32>
    %10 = vector.extract_strided_slice %2 {offsets = [7, 0], sizes = [1, 32], strides = [1, 1]} : vector<13x96xf32> to vector<1x32xf32>
    %11 = vector.extract_strided_slice %2 {offsets = [8, 0], sizes = [1, 32], strides = [1, 1]} : vector<13x96xf32> to vector<1x32xf32>
    %12 = vector.extract_strided_slice %2 {offsets = [9, 0], sizes = [1, 32], strides = [1, 1]} : vector<13x96xf32> to vector<1x32xf32>
    %13 = vector.extract_strided_slice %2 {offsets = [10, 0], sizes = [1, 32], strides = [1, 1]} : vector<13x96xf32> to vector<1x32xf32>
    %14 = vector.extract_strided_slice %2 {offsets = [11, 0], sizes = [1, 32], strides = [1, 1]} : vector<13x96xf32> to vector<1x32xf32>
    %15 = vector.extract_strided_slice %2 {offsets = [12, 0], sizes = [1, 32], strides = [1, 1]} : vector<13x96xf32> to vector<1x32xf32>
    %c0_5 = arith.constant 0 : index
    %c0_6 = arith.constant 0 : index
    %16 = vector.load %arg7[%c0_5, %c0_6] : memref<64x32xf32, #tpu.memory_space<vmem>>, vector<64x32xf32>
    %17 = tpu.iota {dimensions = array<i32: 0>} : vector<8x8xi32>
    %18 = tpu.iota {dimensions = array<i32: 1>} : vector<8x8xi32>
    %19 = arith.cmpi sle, %18, %17 : vector<8x8xi32>
    %cst = arith.constant 0.000000e+00 : f32
    %cst_7 = arith.constant -1.000000e+09 : f32
    %20 = vector.broadcast %cst : f32 to vector<8x8xf32>
    %21 = vector.broadcast %cst_7 : f32 to vector<8x8xf32>
    %22 = arith.select %19, %20, %21 : vector<8x8xi1>, vector<8x8xf32>
    %23 = vector.shape_cast %22 : vector<8x8xf32> to vector<1x8x8xf32>
    %c0_8 = arith.constant 0 : index
    %c0_9 = arith.constant 0 : index
    %24 = vector.load %arg3[%c0_8, %c0_9] : memref<2x8xf32, #tpu.memory_space<vmem>>, vector<2x8xf32>
    %cst_10 = arith.constant 5.000000e-01 : f32
    %25 = vector.broadcast %cst_10 : f32 to vector<2x8xf32>
    %26 = arith.cmpf ogt, %24, %25 : vector<2x8xf32>
    %cst_11 = arith.constant 0.000000e+00 : f32
    %cst_12 = arith.constant -1.000000e+09 : f32
    %27 = vector.broadcast %cst_11 : f32 to vector<2x8xf32>
    %28 = vector.broadcast %cst_12 : f32 to vector<2x8xf32>
    %29 = arith.select %26, %27, %28 : vector<2x8xi1>, vector<2x8xf32>
    %30 = vector.shape_cast %29 : vector<2x8xf32> to vector<2x1x1x8xf32>
    %31 = vector.shape_cast %30 : vector<2x1x1x8xf32> to vector<2x1x1x8xf32>
    %32 = vector.broadcast %31 : vector<2x1x1x8xf32> to vector<2x4x1x8xf32>
    %33 = vector.shape_cast %32 : vector<2x4x1x8xf32> to vector<8x1x8xf32>
    %cst_13 = arith.constant dense<0.000000e+00> : vector<16xf32>
    %34 = vector.multi_reduction <add>, %0, %cst_13 [1] : vector<16x32xf32> to vector<16xf32>
    %35 = vector.shape_cast %34 : vector<16xf32> to vector<16x1xf32>
    %cst_14 = arith.constant 3.200000e+01 : f32
    %36 = vector.broadcast %cst_14 : f32 to vector<16x1xf32>
    %37 = arith.divf %35, %36 : vector<16x1xf32>
    %38 = vector.broadcast %37 : vector<16x1xf32> to vector<16x32xf32>
    %39 = arith.subf %0, %38 : vector<16x32xf32>
    %40 = arith.mulf %39, %39 : vector<16x32xf32>
    %cst_15 = arith.constant dense<0.000000e+00> : vector<16xf32>
    %41 = vector.multi_reduction <add>, %40, %cst_15 [1] : vector<16x32xf32> to vector<16xf32>
    %42 = vector.shape_cast %41 : vector<16xf32> to vector<16x1xf32>
    %cst_16 = arith.constant 3.100000e+01 : f32
    %43 = vector.broadcast %cst_16 : f32 to vector<16x1xf32>
    %44 = arith.divf %42, %43 : vector<16x1xf32>
    %45 = math.sqrt %44 : vector<16x1xf32>
    %46 = vector.broadcast %37 : vector<16x1xf32> to vector<16x32xf32>
    %47 = arith.subf %0, %46 : vector<16x32xf32>
    %48 = vector.broadcast %10 : vector<1x32xf32> to vector<16x32xf32>
    %49 = arith.mulf %48, %47 : vector<16x32xf32>
    %cst_17 = arith.constant 9.99999997E-7 : f32
    %50 = vector.broadcast %cst_17 : f32 to vector<16x1xf32>
    %51 = arith.addf %45, %50 : vector<16x1xf32>
    %52 = vector.broadcast %51 : vector<16x1xf32> to vector<16x32xf32>
    %53 = arith.divf %49, %52 : vector<16x32xf32>
    %54 = vector.broadcast %11 : vector<1x32xf32> to vector<16x32xf32>
    %55 = arith.addf %53, %54 : vector<16x32xf32>
    %c0_18 = arith.constant 0 : index
    %c0_19 = arith.constant 0 : index
    %56 = vector.load %arg4[%c0_18, %c0_19] : memref<32x96xf32, #tpu.memory_space<vmem>>, vector<32x96xf32>
    %cst_20 = arith.constant dense<0.000000e+00> : vector<16x96xf32>
    %57 = tpu.matmul %55, %56, %cst_20 {dimension_numbers = #tpu.dot_dimension_numbers<[1], [0], [0], [1], [0, 0, 1, 1], [], []>} : vector<16x32xf32>, vector<32x96xf32>, vector<16x96xf32> -> vector<16x96xf32>
    %58 = vector.broadcast %3 : vector<1x96xf32> to vector<16x96xf32>
    %59 = arith.addf %57, %58 : vector<16x96xf32>
    %60 = vector.extract_strided_slice %16 {offsets = [0, 0], sizes = [32, 32], strides = [1, 1]} : vector<64x32xf32> to vector<32x32xf32>
    %61 = vector.extract_strided_slice %59 {offsets = [0, 0], sizes = [16, 8], strides = [1, 1]} : vector<16x96xf32> to vector<16x8xf32>
    %62 = vector.shape_cast %61 : vector<16x8xf32> to vector<2x1x8x8xf32>
    %63 = vector.extract_strided_slice %59 {offsets = [0, 8], sizes = [16, 8], strides = [1, 1]} : vector<16x96xf32> to vector<16x8xf32>
    %64 = vector.shape_cast %63 : vector<16x8xf32> to vector<2x1x8x8xf32>
    %65 = vector.extract_strided_slice %59 {offsets = [0, 16], sizes = [16, 8], strides = [1, 1]} : vector<16x96xf32> to vector<16x8xf32>
    %66 = vector.shape_cast %65 : vector<16x8xf32> to vector<2x1x8x8xf32>
    %67 = vector.extract_strided_slice %59 {offsets = [0, 24], sizes = [16, 8], strides = [1, 1]} : vector<16x96xf32> to vector<16x8xf32>
    %68 = vector.shape_cast %67 : vector<16x8xf32> to vector<2x1x8x8xf32>
    %69 = tpu.concatenate %62, %64, %66, %68 in 1 : vector<2x1x8x8xf32>, vector<2x1x8x8xf32>, vector<2x1x8x8xf32>, vector<2x1x8x8xf32> -> vector<2x4x8x8xf32>
    %70 = vector.shape_cast %69 : vector<2x4x8x8xf32> to vector<8x8x8xf32>
    %71 = vector.extract_strided_slice %59 {offsets = [0, 32], sizes = [16, 8], strides = [1, 1]} : vector<16x96xf32> to vector<16x8xf32>
    %72 = vector.shape_cast %71 : vector<16x8xf32> to vector<2x1x8x8xf32>
    %73 = vector.extract_strided_slice %59 {offsets = [0, 40], sizes = [16, 8], strides = [1, 1]} : vector<16x96xf32> to vector<16x8xf32>
    %74 = vector.shape_cast %73 : vector<16x8xf32> to vector<2x1x8x8xf32>
    %75 = vector.extract_strided_slice %59 {offsets = [0, 48], sizes = [16, 8], strides = [1, 1]} : vector<16x96xf32> to vector<16x8xf32>
    %76 = vector.shape_cast %75 : vector<16x8xf32> to vector<2x1x8x8xf32>
    %77 = vector.extract_strided_slice %59 {offsets = [0, 56], sizes = [16, 8], strides = [1, 1]} : vector<16x96xf32> to vector<16x8xf32>
    %78 = vector.shape_cast %77 : vector<16x8xf32> to vector<2x1x8x8xf32>
    %79 = tpu.concatenate %72, %74, %76, %78 in 1 : vector<2x1x8x8xf32>, vector<2x1x8x8xf32>, vector<2x1x8x8xf32>, vector<2x1x8x8xf32> -> vector<2x4x8x8xf32>
    %80 = vector.shape_cast %79 : vector<2x4x8x8xf32> to vector<8x8x8xf32>
    %81 = vector.extract_strided_slice %59 {offsets = [0, 64], sizes = [16, 8], strides = [1, 1]} : vector<16x96xf32> to vector<16x8xf32>
    %82 = vector.shape_cast %81 : vector<16x8xf32> to vector<2x1x8x8xf32>
    %83 = vector.extract_strided_slice %59 {offsets = [0, 72], sizes = [16, 8], strides = [1, 1]} : vector<16x96xf32> to vector<16x8xf32>
    %84 = vector.shape_cast %83 : vector<16x8xf32> to vector<2x1x8x8xf32>
    %85 = vector.extract_strided_slice %59 {offsets = [0, 80], sizes = [16, 8], strides = [1, 1]} : vector<16x96xf32> to vector<16x8xf32>
    %86 = vector.shape_cast %85 : vector<16x8xf32> to vector<2x1x8x8xf32>
    %87 = vector.extract_strided_slice %59 {offsets = [0, 88], sizes = [16, 8], strides = [1, 1]} : vector<16x96xf32> to vector<16x8xf32>
    %88 = vector.shape_cast %87 : vector<16x8xf32> to vector<2x1x8x8xf32>
    %89 = tpu.concatenate %82, %84, %86, %88 in 1 : vector<2x1x8x8xf32>, vector<2x1x8x8xf32>, vector<2x1x8x8xf32>, vector<2x1x8x8xf32> -> vector<2x4x8x8xf32>
    %90 = vector.shape_cast %89 : vector<2x4x8x8xf32> to vector<8x8x8xf32>
    "tpu.trace_start"() <{level = 10 : i32, message = "bqf,bkf->bqk"}> : () -> ()
    %cst_21 = arith.constant dense<0.000000e+00> : vector<8x8x8xf32>
    %91 = tpu.matmul %70, %80, %cst_21 {dimension_numbers = #tpu.dot_dimension_numbers<[2], [2], [1], [1], [0, 0, 0, 1, 1, 1], [0], [0]>} : vector<8x8x8xf32>, vector<8x8x8xf32>, vector<8x8x8xf32> -> vector<8x8x8xf32>
    "tpu.trace_stop"() : () -> ()
    %92 = vector.broadcast %23 : vector<1x8x8xf32> to vector<8x8x8xf32>
    %93 = arith.addf %91, %92 : vector<8x8x8xf32>
    %cst_22 = arith.constant dense<0xFF800000> : vector<8x8xf32>
    %94 = vector.multi_reduction <maximumf>, %93, %cst_22 [2] : vector<8x8x8xf32> to vector<8x8xf32>
    %95 = vector.shape_cast %94 : vector<8x8xf32> to vector<8x8x1xf32>
    %96 = vector.broadcast %95 : vector<8x8x1xf32> to vector<8x8x8xf32>
    %97 = arith.subf %93, %96 : vector<8x8x8xf32>
    %98 = math.exp %97 : vector<8x8x8xf32>
    %cst_23 = arith.constant dense<0.000000e+00> : vector<8x8xf32>
    %99 = vector.multi_reduction <add>, %98, %cst_23 [2] : vector<8x8x8xf32> to vector<8x8xf32>
    %100 = vector.shape_cast %99 : vector<8x8xf32> to vector<8x8x1xf32>
    %101 = tpu.reciprocal %100 {approx = true} : vector<8x8x1xf32> -> vector<8x8x1xf32>
    %102 = vector.broadcast %101 : vector<8x8x1xf32> to vector<8x8x8xf32>
    %103 = arith.mulf %98, %102 : vector<8x8x8xf32>
    "tpu.trace_start"() <{level = 10 : i32, message = "bqk,bkf->bqf"}> : () -> ()
    %cst_24 = arith.constant dense<0.000000e+00> : vector<8x8x8xf32>
    %104 = tpu.matmul %103, %90, %cst_24 {dimension_numbers = #tpu.dot_dimension_numbers<[2], [1], [1], [2], [0, 0, 0, 1, 1, 2], [0], [0]>} : vector<8x8x8xf32>, vector<8x8x8xf32>, vector<8x8x8xf32> -> vector<8x8x8xf32>
    "tpu.trace_stop"() : () -> ()
    %105 = vector.shape_cast %104 : vector<8x8x8xf32> to vector<2x4x8x8xf32>
    %106 = vector.extract_strided_slice %105 {offsets = [0, 0, 0, 0], sizes = [2, 1, 8, 8], strides = [1, 1, 1, 1]} : vector<2x4x8x8xf32> to vector<2x1x8x8xf32>
    %107 = vector.shape_cast %106 : vector<2x1x8x8xf32> to vector<2x8x8xf32>
    %108 = vector.extract_strided_slice %105 {offsets = [0, 1, 0, 0], sizes = [2, 1, 8, 8], strides = [1, 1, 1, 1]} : vector<2x4x8x8xf32> to vector<2x1x8x8xf32>
    %109 = vector.shape_cast %108 : vector<2x1x8x8xf32> to vector<2x8x8xf32>
    %110 = vector.extract_strided_slice %105 {offsets = [0, 2, 0, 0], sizes = [2, 1, 8, 8], strides = [1, 1, 1, 1]} : vector<2x4x8x8xf32> to vector<2x1x8x8xf32>
    %111 = vector.shape_cast %110 : vector<2x1x8x8xf32> to vector<2x8x8xf32>
    %112 = vector.extract_strided_slice %105 {offsets = [0, 3, 0, 0], sizes = [2, 1, 8, 8], strides = [1, 1, 1, 1]} : vector<2x4x8x8xf32> to vector<2x1x8x8xf32>
    %113 = vector.shape_cast %112 : vector<2x1x8x8xf32> to vector<2x8x8xf32>
    %114 = tpu.concatenate %107, %109, %111, %113 in 2 : vector<2x8x8xf32>, vector<2x8x8xf32>, vector<2x8x8xf32>, vector<2x8x8xf32> -> vector<2x8x32xf32>
    %115 = vector.shape_cast %114 : vector<2x8x32xf32> to vector<16x32xf32>
    %cst_25 = arith.constant dense<0.000000e+00> : vector<16x32xf32>
    %116 = tpu.matmul %115, %60, %cst_25 {dimension_numbers = #tpu.dot_dimension_numbers<[1], [0], [0], [1], [0, 0, 1, 1], [], []>} : vector<16x32xf32>, vector<32x32xf32>, vector<16x32xf32> -> vector<16x32xf32>
    %117 = vector.broadcast %6 : vector<1x32xf32> to vector<16x32xf32>
    %118 = arith.addf %116, %117 : vector<16x32xf32>
    %119 = arith.addf %0, %118 : vector<16x32xf32>
    %cst_26 = arith.constant dense<0.000000e+00> : vector<16xf32>
    %120 = vector.multi_reduction <add>, %119, %cst_26 [1] : vector<16x32xf32> to vector<16xf32>
    %121 = vector.shape_cast %120 : vector<16xf32> to vector<16x1xf32>
    %cst_27 = arith.constant 3.200000e+01 : f32
    %122 = vector.broadcast %cst_27 : f32 to vector<16x1xf32>
    %123 = arith.divf %121, %122 : vector<16x1xf32>
    %124 = vector.broadcast %123 : vector<16x1xf32> to vector<16x32xf32>
    %125 = arith.subf %119, %124 : vector<16x32xf32>
    %126 = arith.mulf %125, %125 : vector<16x32xf32>
    %cst_28 = arith.constant dense<0.000000e+00> : vector<16xf32>
    %127 = vector.multi_reduction <add>, %126, %cst_28 [1] : vector<16x32xf32> to vector<16xf32>
    %128 = vector.shape_cast %127 : vector<16xf32> to vector<16x1xf32>
    %cst_29 = arith.constant 3.100000e+01 : f32
    %129 = vector.broadcast %cst_29 : f32 to vector<16x1xf32>
    %130 = arith.divf %128, %129 : vector<16x1xf32>
    %131 = math.sqrt %130 : vector<16x1xf32>
    %132 = vector.broadcast %123 : vector<16x1xf32> to vector<16x32xf32>
    %133 = arith.subf %119, %132 : vector<16x32xf32>
    %134 = vector.broadcast %12 : vector<1x32xf32> to vector<16x32xf32>
    %135 = arith.mulf %134, %133 : vector<16x32xf32>
    %cst_30 = arith.constant 9.99999997E-7 : f32
    %136 = vector.broadcast %cst_30 : f32 to vector<16x1xf32>
    %137 = arith.addf %131, %136 : vector<16x1xf32>
    %138 = vector.broadcast %137 : vector<16x1xf32> to vector<16x32xf32>
    %139 = arith.divf %135, %138 : vector<16x32xf32>
    %140 = vector.broadcast %13 : vector<1x32xf32> to vector<16x32xf32>
    %141 = arith.addf %139, %140 : vector<16x32xf32>
    %c0_31 = arith.constant 0 : index
    %c0_32 = arith.constant 0 : index
    %142 = vector.load %arg5[%c0_31, %c0_32] : memref<32x32xf32, #tpu.memory_space<vmem>>, vector<32x32xf32>
    %cst_33 = arith.constant dense<0.000000e+00> : vector<16x32xf32>
    %143 = tpu.matmul %141, %142, %cst_33 {dimension_numbers = #tpu.dot_dimension_numbers<[1], [0], [0], [1], [0, 0, 1, 1], [], []>} : vector<16x32xf32>, vector<32x32xf32>, vector<16x32xf32> -> vector<16x32xf32>
    %144 = vector.broadcast %4 : vector<1x32xf32> to vector<16x32xf32>
    %145 = arith.addf %143, %144 : vector<16x32xf32>
    %c0_34 = arith.constant 0 : index
    %c0_35 = arith.constant 0 : index
    %146 = vector.load %arg6[%c0_34, %c0_35] : memref<32x64xf32, #tpu.memory_space<vmem>>, vector<32x64xf32>
    %cst_36 = arith.constant dense<0.000000e+00> : vector<16x64xf32>
    %147 = tpu.matmul %1, %146, %cst_36 {dimension_numbers = #tpu.dot_dimension_numbers<[1], [0], [0], [1], [0, 0, 1, 1], [], []>} : vector<16x32xf32>, vector<32x64xf32>, vector<16x64xf32> -> vector<16x64xf32>
    %148 = vector.broadcast %5 : vector<1x64xf32> to vector<16x64xf32>
    %149 = arith.addf %147, %148 : vector<16x64xf32>
    %150 = vector.extract_strided_slice %16 {offsets = [32, 0], sizes = [32, 32], strides = [1, 1]} : vector<64x32xf32> to vector<32x32xf32>
    %151 = vector.extract_strided_slice %145 {offsets = [0, 0], sizes = [16, 8], strides = [1, 1]} : vector<16x32xf32> to vector<16x8xf32>
    %152 = vector.shape_cast %151 : vector<16x8xf32> to vector<2x1x8x8xf32>
    %153 = vector.extract_strided_slice %145 {offsets = [0, 8], sizes = [16, 8], strides = [1, 1]} : vector<16x32xf32> to vector<16x8xf32>
    %154 = vector.shape_cast %153 : vector<16x8xf32> to vector<2x1x8x8xf32>
    %155 = vector.extract_strided_slice %145 {offsets = [0, 16], sizes = [16, 8], strides = [1, 1]} : vector<16x32xf32> to vector<16x8xf32>
    %156 = vector.shape_cast %155 : vector<16x8xf32> to vector<2x1x8x8xf32>
    %157 = vector.extract_strided_slice %145 {offsets = [0, 24], sizes = [16, 8], strides = [1, 1]} : vector<16x32xf32> to vector<16x8xf32>
    %158 = vector.shape_cast %157 : vector<16x8xf32> to vector<2x1x8x8xf32>
    %159 = tpu.concatenate %152, %154, %156, %158 in 1 : vector<2x1x8x8xf32>, vector<2x1x8x8xf32>, vector<2x1x8x8xf32>, vector<2x1x8x8xf32> -> vector<2x4x8x8xf32>
    %160 = vector.shape_cast %159 : vector<2x4x8x8xf32> to vector<8x8x8xf32>
    %161 = vector.extract_strided_slice %149 {offsets = [0, 0], sizes = [16, 8], strides = [1, 1]} : vector<16x64xf32> to vector<16x8xf32>
    %162 = vector.shape_cast %161 : vector<16x8xf32> to vector<2x1x8x8xf32>
    %163 = vector.extract_strided_slice %149 {offsets = [0, 8], sizes = [16, 8], strides = [1, 1]} : vector<16x64xf32> to vector<16x8xf32>
    %164 = vector.shape_cast %163 : vector<16x8xf32> to vector<2x1x8x8xf32>
    %165 = vector.extract_strided_slice %149 {offsets = [0, 16], sizes = [16, 8], strides = [1, 1]} : vector<16x64xf32> to vector<16x8xf32>
    %166 = vector.shape_cast %165 : vector<16x8xf32> to vector<2x1x8x8xf32>
    %167 = vector.extract_strided_slice %149 {offsets = [0, 24], sizes = [16, 8], strides = [1, 1]} : vector<16x64xf32> to vector<16x8xf32>
    %168 = vector.shape_cast %167 : vector<16x8xf32> to vector<2x1x8x8xf32>
    %169 = tpu.concatenate %162, %164, %166, %168 in 1 : vector<2x1x8x8xf32>, vector<2x1x8x8xf32>, vector<2x1x8x8xf32>, vector<2x1x8x8xf32> -> vector<2x4x8x8xf32>
    %170 = vector.shape_cast %169 : vector<2x4x8x8xf32> to vector<8x8x8xf32>
    %171 = vector.extract_strided_slice %149 {offsets = [0, 32], sizes = [16, 8], strides = [1, 1]} : vector<16x64xf32> to vector<16x8xf32>
    %172 = vector.shape_cast %171 : vector<16x8xf32> to vector<2x1x8x8xf32>
    %173 = vector.extract_strided_slice %149 {offsets = [0, 40], sizes = [16, 8], strides = [1, 1]} : vector<16x64xf32> to vector<16x8xf32>
    %174 = vector.shape_cast %173 : vector<16x8xf32> to vector<2x1x8x8xf32>
    %175 = vector.extract_strided_slice %149 {offsets = [0, 48], sizes = [16, 8], strides = [1, 1]} : vector<16x64xf32> to vector<16x8xf32>
    %176 = vector.shape_cast %175 : vector<16x8xf32> to vector<2x1x8x8xf32>
    %177 = vector.extract_strided_slice %149 {offsets = [0, 56], sizes = [16, 8], strides = [1, 1]} : vector<16x64xf32> to vector<16x8xf32>
    %178 = vector.shape_cast %177 : vector<16x8xf32> to vector<2x1x8x8xf32>
    %179 = tpu.concatenate %172, %174, %176, %178 in 1 : vector<2x1x8x8xf32>, vector<2x1x8x8xf32>, vector<2x1x8x8xf32>, vector<2x1x8x8xf32> -> vector<2x4x8x8xf32>
    %180 = vector.shape_cast %179 : vector<2x4x8x8xf32> to vector<8x8x8xf32>
    "tpu.trace_start"() <{level = 10 : i32, message = "bqf,bkf->bqk"}> : () -> ()
    %cst_37 = arith.constant dense<0.000000e+00> : vector<8x8x8xf32>
    %181 = tpu.matmul %160, %170, %cst_37 {dimension_numbers = #tpu.dot_dimension_numbers<[2], [2], [1], [1], [0, 0, 0, 1, 1, 1], [0], [0]>} : vector<8x8x8xf32>, vector<8x8x8xf32>, vector<8x8x8xf32> -> vector<8x8x8xf32>
    "tpu.trace_stop"() : () -> ()
    %182 = vector.broadcast %33 : vector<8x1x8xf32> to vector<8x8x8xf32>
    %183 = arith.addf %181, %182 : vector<8x8x8xf32>
    %cst_38 = arith.constant dense<0xFF800000> : vector<8x8xf32>
    %184 = vector.multi_reduction <maximumf>, %183, %cst_38 [2] : vector<8x8x8xf32> to vector<8x8xf32>
    %185 = vector.shape_cast %184 : vector<8x8xf32> to vector<8x8x1xf32>
    %186 = vector.broadcast %185 : vector<8x8x1xf32> to vector<8x8x8xf32>
    %187 = arith.subf %183, %186 : vector<8x8x8xf32>
    %188 = math.exp %187 : vector<8x8x8xf32>
    %cst_39 = arith.constant dense<0.000000e+00> : vector<8x8xf32>
    %189 = vector.multi_reduction <add>, %188, %cst_39 [2] : vector<8x8x8xf32> to vector<8x8xf32>
    %190 = vector.shape_cast %189 : vector<8x8xf32> to vector<8x8x1xf32>
    %191 = tpu.reciprocal %190 {approx = true} : vector<8x8x1xf32> -> vector<8x8x1xf32>
    %192 = vector.broadcast %191 : vector<8x8x1xf32> to vector<8x8x8xf32>
    %193 = arith.mulf %188, %192 : vector<8x8x8xf32>
    "tpu.trace_start"() <{level = 10 : i32, message = "bqk,bkf->bqf"}> : () -> ()
    %cst_40 = arith.constant dense<0.000000e+00> : vector<8x8x8xf32>
    %194 = tpu.matmul %193, %180, %cst_40 {dimension_numbers = #tpu.dot_dimension_numbers<[2], [1], [1], [2], [0, 0, 0, 1, 1, 2], [0], [0]>} : vector<8x8x8xf32>, vector<8x8x8xf32>, vector<8x8x8xf32> -> vector<8x8x8xf32>
    "tpu.trace_stop"() : () -> ()
    %195 = vector.shape_cast %194 : vector<8x8x8xf32> to vector<2x4x8x8xf32>
    %196 = vector.extract_strided_slice %195 {offsets = [0, 0, 0, 0], sizes = [2, 1, 8, 8], strides = [1, 1, 1, 1]} : vector<2x4x8x8xf32> to vector<2x1x8x8xf32>
    %197 = vector.shape_cast %196 : vector<2x1x8x8xf32> to vector<2x8x8xf32>
    %198 = vector.extract_strided_slice %195 {offsets = [0, 1, 0, 0], sizes = [2, 1, 8, 8], strides = [1, 1, 1, 1]} : vector<2x4x8x8xf32> to vector<2x1x8x8xf32>
    %199 = vector.shape_cast %198 : vector<2x1x8x8xf32> to vector<2x8x8xf32>
    %200 = vector.extract_strided_slice %195 {offsets = [0, 2, 0, 0], sizes = [2, 1, 8, 8], strides = [1, 1, 1, 1]} : vector<2x4x8x8xf32> to vector<2x1x8x8xf32>
    %201 = vector.shape_cast %200 : vector<2x1x8x8xf32> to vector<2x8x8xf32>
    %202 = vector.extract_strided_slice %195 {offsets = [0, 3, 0, 0], sizes = [2, 1, 8, 8], strides = [1, 1, 1, 1]} : vector<2x4x8x8xf32> to vector<2x1x8x8xf32>
    %203 = vector.shape_cast %202 : vector<2x1x8x8xf32> to vector<2x8x8xf32>
    %204 = tpu.concatenate %197, %199, %201, %203 in 2 : vector<2x8x8xf32>, vector<2x8x8xf32>, vector<2x8x8xf32>, vector<2x8x8xf32> -> vector<2x8x32xf32>
    %205 = vector.shape_cast %204 : vector<2x8x32xf32> to vector<16x32xf32>
    %cst_41 = arith.constant dense<0.000000e+00> : vector<16x32xf32>
    %206 = tpu.matmul %205, %150, %cst_41 {dimension_numbers = #tpu.dot_dimension_numbers<[1], [0], [0], [1], [0, 0, 1, 1], [], []>} : vector<16x32xf32>, vector<32x32xf32>, vector<16x32xf32> -> vector<16x32xf32>
    %207 = vector.broadcast %7 : vector<1x32xf32> to vector<16x32xf32>
    %208 = arith.addf %206, %207 : vector<16x32xf32>
    %209 = arith.addf %119, %208 : vector<16x32xf32>
    %cst_42 = arith.constant dense<0.000000e+00> : vector<16xf32>
    %210 = vector.multi_reduction <add>, %209, %cst_42 [1] : vector<16x32xf32> to vector<16xf32>
    %211 = vector.shape_cast %210 : vector<16xf32> to vector<16x1xf32>
    %cst_43 = arith.constant 3.200000e+01 : f32
    %212 = vector.broadcast %cst_43 : f32 to vector<16x1xf32>
    %213 = arith.divf %211, %212 : vector<16x1xf32>
    %214 = vector.broadcast %213 : vector<16x1xf32> to vector<16x32xf32>
    %215 = arith.subf %209, %214 : vector<16x32xf32>
    %216 = arith.mulf %215, %215 : vector<16x32xf32>
    %cst_44 = arith.constant dense<0.000000e+00> : vector<16xf32>
    %217 = vector.multi_reduction <add>, %216, %cst_44 [1] : vector<16x32xf32> to vector<16xf32>
    %218 = vector.shape_cast %217 : vector<16xf32> to vector<16x1xf32>
    %cst_45 = arith.constant 3.100000e+01 : f32
    %219 = vector.broadcast %cst_45 : f32 to vector<16x1xf32>
    %220 = arith.divf %218, %219 : vector<16x1xf32>
    %221 = math.sqrt %220 : vector<16x1xf32>
    %222 = vector.broadcast %213 : vector<16x1xf32> to vector<16x32xf32>
    %223 = arith.subf %209, %222 : vector<16x32xf32>
    %224 = vector.broadcast %14 : vector<1x32xf32> to vector<16x32xf32>
    %225 = arith.mulf %224, %223 : vector<16x32xf32>
    %cst_46 = arith.constant 9.99999997E-7 : f32
    %226 = vector.broadcast %cst_46 : f32 to vector<16x1xf32>
    %227 = arith.addf %221, %226 : vector<16x1xf32>
    %228 = vector.broadcast %227 : vector<16x1xf32> to vector<16x32xf32>
    %229 = arith.divf %225, %228 : vector<16x32xf32>
    %230 = vector.broadcast %15 : vector<1x32xf32> to vector<16x32xf32>
    %231 = arith.addf %229, %230 : vector<16x32xf32>
    %c0_47 = arith.constant 0 : index
    %c0_48 = arith.constant 0 : index
    %232 = vector.load %arg8[%c0_47, %c0_48] : memref<32x64xf32, #tpu.memory_space<vmem>>, vector<32x64xf32>
    %cst_49 = arith.constant dense<0.000000e+00> : vector<16x64xf32>
    %233 = tpu.matmul %231, %232, %cst_49 {dimension_numbers = #tpu.dot_dimension_numbers<[1], [0], [0], [1], [0, 0, 1, 1], [], []>} : vector<16x32xf32>, vector<32x64xf32>, vector<16x64xf32> -> vector<16x64xf32>
    %234 = vector.broadcast %8 : vector<1x64xf32> to vector<16x64xf32>
    %235 = arith.addf %233, %234 : vector<16x64xf32>
    %cst_50 = arith.constant 0.000000e+00 : f32
    %236 = vector.broadcast %cst_50 : f32 to vector<16x64xf32>
    %237 = arith.maximumf %235, %236 : vector<16x64xf32>
    %c0_51 = arith.constant 0 : index
    %c0_52 = arith.constant 0 : index
    %238 = vector.load %arg9[%c0_51, %c0_52] : memref<64x32xf32, #tpu.memory_space<vmem>>, vector<64x32xf32>
    %cst_53 = arith.constant dense<0.000000e+00> : vector<16x32xf32>
    %239 = tpu.matmul %237, %238, %cst_53 {dimension_numbers = #tpu.dot_dimension_numbers<[1], [0], [0], [1], [0, 0, 1, 1], [], []>} : vector<16x64xf32>, vector<64x32xf32>, vector<16x32xf32> -> vector<16x32xf32>
    %240 = arith.addf %209, %239 : vector<16x32xf32>
    %241 = vector.broadcast %9 : vector<1x32xf32> to vector<16x32xf32>
    %242 = arith.addf %240, %241 : vector<16x32xf32>
    %c0_54 = arith.constant 0 : index
    %c0_55 = arith.constant 0 : index
    %243 = vector.load %arg11[%c0_54, %c0_55] : memref<16x32xf32, #tpu.memory_space<vmem>>, vector<16x32xf32>
    tpu.vector_store %arg11[%c0_54, %c0_55], %242 {strides = array<i32>} : memref<16x32xf32, #tpu.memory_space<vmem>>, vector<16x32xf32>,
    return
  }
  func.func @transform_0(%arg0: i32) -> (i32, i32) {
    %c0_i32 = arith.constant 0 : i32
    %c0_i32_0 = arith.constant 0 : i32
    %c0_i32_1 = arith.constant 0 : i32
    return %c0_i32, %c0_i32_0 : i32, i32
  }
  func.func @transform_1(%arg0: i32) -> (i32, i32) {
    %c0_i32 = arith.constant 0 : i32
    %c0_i32_0 = arith.constant 0 : i32
    %c0_i32_1 = arith.constant 0 : i32
    return %c0_i32, %c0_i32_0 : i32, i32
  }
  func.func @transform_2(%arg0: i32) -> (i32, i32) {
    %c0_i32 = arith.constant 0 : i32
    %c0_i32_0 = arith.constant 0 : i32
    %c0_i32_1 = arith.constant 0 : i32
    return %c0_i32, %c0_i32_0 : i32, i32
  }
  func.func @transform_3(%arg0: i32) -> (i32, i32) {
    %c0_i32 = arith.constant 0 : i32
    %c0_i32_0 = arith.constant 0 : i32
    %c0_i32_1 = arith.constant 0 : i32
    return %c0_i32, %c0_i32_0 : i32, i32
  }
  func.func @transform_4(%arg0: i32) -> (i32, i32) {
    %c0_i32 = arith.constant 0 : i32
    %c0_i32_0 = arith.constant 0 : i32
    %c0_i32_1 = arith.constant 0 : i32
    return %c0_i32, %c0_i32_0 : i32, i32
  }
  func.func @transform_5(%arg0: i32) -> (i32, i32) {
    %c0_i32 = arith.constant 0 : i32
    %c0_i32_0 = arith.constant 0 : i32
    %c0_i32_1 = arith.constant 0 : i32
    return %c0_i32, %c0_i32_0 : i32, i32
  }
  func.func @transform_6(%arg0: i32) -> (i32, i32) {
    %c0_i32 = arith.constant 0 : i32
    %c0_i32_0 = arith.constant 0 : i32
    %c0_i32_1 = arith.constant 0 : i32
    return %c0_i32, %c0_i32_0 : i32, i32
  }
  func.func @transform_7(%arg0: i32) -> (i32, i32) {
    %c0_i32 = arith.constant 0 : i32
    %c0_i32_0 = arith.constant 0 : i32
    %c0_i32_1 = arith.constant 0 : i32
    return %c0_i32, %c0_i32_0 : i32, i32
  }
  func.func @transform_8(%arg0: i32) -> (i32, i32) {
    %c0_i32 = arith.constant 0 : i32
    %c0_i32_0 = arith.constant 0 : i32
    %c0_i32_1 = arith.constant 0 : i32
    return %c0_i32, %c0_i32_0 : i32, i32
  }
  func.func @transform_9(%arg0: i32) -> (i32, i32) {
    %c0_i32 = arith.constant 0 : i32
    %c0_i32_0 = arith.constant 0 : i32
    %c0_i32_1 = arith.constant 0 : i32
    return %c0_i32, %c0_i32_0 : i32, i32
  }
  func.func @transform_10(%arg0: i32) -> (i32, i32) {
    %c0_i32 = arith.constant 0 : i32
    %c0_i32_0 = arith.constant 0 : i32
    %c0_i32_1 = arith.constant 0 : i32
    return %c0_i32, %c0_i32_0 : i32, i32
  }
}

</mosaic_0001>

<bundles_post_ra>
// kernel: _decode_layer_forward.1
= control target key start
LH: loop header
LB: loop body
LE: loop exit
PB: predicated region body
PF: predicated region fallthrough
CT: control target
= control target key end

     0   :  { %15 = vsyncpa [#allocation3], 0  ;;  %s4919_s0 = inlined_call_operand.vmem [shape: f32[16,32], index: 0, kind: input, shape index: {}]   ;;  %s4920_s1 = inlined_call_operand.vmem [shape: f32[16,32], index: 1, kind: input, shape index: {}]   ;;  %s4921_s2 = inlined_call_operand.vmem [shape: f32[2,8], index: 2, kind: input, shape index: {}]   ;;  %s4922_s3 = inlined_call_operand.vmem [shape: f32[32,96], index: 3, kind: input, shape index: {}]   ;;  %s4923_s4 = inlined_call_operand.vmem [shape: f32[32,32], index: 4, kind: input, shape index: {}]   ;;  %s4924_s5 = inlined_call_operand.vmem [shape: f32[32,64], index: 5, kind: input, shape index: {}]   ;;  %s4925_s6 = inlined_call_operand.vmem [shape: f32[64,32], index: 6, kind: input, shape index: {}]   ;;  %s4926_s7 = inlined_call_operand.vmem [shape: f32[32,64], index: 7, kind: input, shape index: {}]   ;;  %s4927_s8 = inlined_call_operand.vmem [shape: f32[64,32], index: 8, kind: input, shape index: {}]   ;;  %s4928_s9 = inlined_call_operand.hbm [shape: f32[13,96], index: 9, kind: input, shape index: {}]   ;;  %s4929_s10 = inlined_call_operand.hbm [shape: f32[16,32], index: 10, kind: output, shape index: {}]  }
   0x1   :  { %16 = vsyncpa [#allocation4], 0  ;;  %s4245_s13 = smov [#allocation2]   ;;  %s4197_s17 = scalar_lea.hbm %s4928_s9, 256 }
   0x2   :  { %s40_s14 = sshll.u32 %s4245_s13, 4  ;;  %p4198_p0 = scmp.ne.s32.totalorder %s4928_s9, %s4197_s17  ;;  %s41_s14 = int_to_ptr.vmem [resolvable:$true] %s40_s14 }
   0x3   :  { %p4201_p1 = scmp.lt.u32.totalorder %s4197_s17, %s4928_s9 }
   0x5   :  { %p4203_p2 = pnand %p4201_p1, %p4198_p0 }
   0x7   :  { %4206 = shalt.err (!%p4203_p2)
}
   0x8   :  { %s4207_s22 = scalar_lea.vmem %s41_s14, 256  ;;  %p4212_p4 = scmp.lt.s32.totalorder %s41_s14, %s41_s14 }
   0x9   :  { %p4208_p3 = scmp.ne.s32.totalorder %s41_s14, %s4207_s22  ;;  %p4213_p5 = scmp.lt.s32.totalorder %s4207_s22, %s4207_s22 }
   0xb   :  { %p4214_p6 = por %p4213_p5, %p4212_p4 }
   0xd   :  { %p4215_p7 = pnand %p4214_p6, %p4208_p3 }
   0xf   :  { %4218 = shalt.err (!%p4215_p7)
}
  0x10   :  { %s4246_s23 = smov 128   ;;  %s4247_s24 = smov 8  }
  0x11   :  { %46 = dma.hbm_to_vmem [thread:$0]  %s4928_s9, 256, %s41_s14, [#allocation3], %s4246_s23, %s4246_s23, %s4247_s24  }
  0x12   :  { %4241 = dma.done.wait [#allocation3], 256  }
  0x13   :  { %4242 = vsyncadd [#allocation3], 4294967040  ;;  %vm96_vm0 = vcmask 261120   ;;  %v4333_v0 = vld [vmem:[%s4919_s0] sm:$0xff]  ;;  %v4338_v1 = vld [vmem:[%s4919_s0 + $0x8] sm:$0xff]  ;;  %v64_v25 = vlaneseq  ;;  %v4248_v52 = vmov 0.0  }
  0x14   :  { %v97_v2 = vsel %vm96_vm0, %v4333_v0, 0.0  ;;  %v100_v3 = vsel %vm96_vm0, %v4338_v1, 0.0  ;;  %v151_v14 = vld [vmem:[%s4922_s3] sm:$0xff]  ;;  %v152_v15 = vld [vmem:[%s4922_s3 + $0x8] sm:$0xff]  ;;  %v153_v16 = vld [vmem:[%s4922_s3 + $0x10] sm:$0xff]  ;;  %3804 = vmatprep.subr.mxu0 %v4248_v52  ;;  %vm4249_vm5 = vmmov 0  }
  0x15   :  { %98 = vadd.xlane.f32.xlu0 %v97_v2  ;;  %v4028_v17 = vpack.c.bf16 %v152_v15, %v151_v14  ;;  %v154_v18 = vld [vmem:[%s4922_s3 + $0x18] sm:$0xff]  ;;  %v4361_v30 = vshrl.u32 %v64_v25, 7  ;;  %v4364_v38 = vld [vmem:[#allocation2] sm:$0xff]  ;;  %v4370_v42 = vld [vmem:[#allocation2 + $0x8] sm:$0x1f]  ;;  %3806 = vmatprep.mubr.msk.f32.mxu0 %vm4249_vm5, %v4248_v52  ;;  %s4250_s3 = smov 112  }
  0x16   :  { %v4032_v19 = vpack.c.bf16 %v154_v18, %v153_v16  ;;  %s4251_s17 = smov 120   ;;  %s4252_s18 = smov 104   ;;  %vm256_vm6 = vcmask 64512   ;;  %vm1585_vm8 = vcmask 130048   ;;  %vm1588_vm9 = vcmask 195584  }
  0x17   :  { %4029 = vmatprep.subr.bf16.mxu1 %v4028_v17  ;;  %v135_v36 = vsub.s32 7, %v4361_v30  ;;  %v4368_v41 = vsub.s32 0, %v4361_v30  ;;  %s4253_s19 = smov 96   ;;  %s4255_s20 = smov 64  }
  0x18   :  { %4031 = vmatpush3.bf16.msra.mxu1 %v4028_v17  ;;  %s4256_s0 = smov 16   ;;  %s4257_s9 = smov 24  }
  0x19   :  { %101 = vadd.xlane.f32.xlu0 %v100_v3  ;;  %4033 = vmatprep.subr.bf16.mxu1 %v4032_v19  ;;  %v136_v40 = vrot.slane %v4364_v38, %v135_v36  ;;  %v148_v44 = vrot.slane %v4370_v42, %v4368_v41  ;;  %v158_v53 = vrot.slane %v4364_v38, %v4368_v41 }
  0x1c   :  { %4035 = vmatpush3.bf16.msra.mxu1 %v4032_v19 }
  0x1d   :  { %3794 = vmatprep.subr.mxu1 %v4248_v52 }
  0xa2   :  { %v99_v4 = vpop.xlane.xlu0 %98 }
  0xa3   :  { %v104_v5 = vmul.f32 0.03125, %v99_v4 }
  0xa5   :  { %v106_v6 = vsub.f32 %v4333_v0, %v104_v5 }
  0xa6   :  { %v102_v7 = vpop.xlane.xlu0 %101 }
  0xa7   :  { %v105_v8 = vmul.f32 0.03125, %v102_v7  ;;  %v108_v9 = vmul.f32 %v106_v6, %v106_v6  ;;  %v137_v43 = vmul.f32 %v136_v40, %v106_v6 }
  0xa9   :  { %v107_v10 = vsub.f32 %v4338_v1, %v105_v8  ;;  %v110_v11 = vsel %vm96_vm0, %v108_v9, 0.0 }
  0xaa   :  { %111 = vadd.xlane.f32.xlu1 %v110_v11  ;;  %v4254_v11 = vmov -1e+09  }
  0xab   :  { %v109_v12 = vmul.f32 %v107_v10, %v107_v10  ;;  %v138_v47 = vmul.f32 %v136_v40, %v107_v10  ;;  %v67_v10 = vand.u32 127, %v64_v25 }
  0xad   :  { %v113_v13 = vsel %vm96_vm0, %v109_v12, 0.0  ;;  %vm68_vm7 = vcmp.le.s32.totalorder %v67_v10, %v4361_v30 }
  0xae   :  { %114 = vadd.xlane.f32.xlu1 %v113_v13  ;;  %v69_v12 = vsel %vm68_vm7, 0.0, %v4254_v11 }
 0x137   :  { %v112_v20 = vpop.xlane.xlu1 %111 }
 0x138   :  { %v117_v21 = vmul.f32 0.032258064, %v112_v20 }
 0x13a   :  { %4107 = vrsqrt.f32 %v117_v21  ;;  %vm121_vm1 = vcmp.eq.f32.partialorder %v117_v21, inf  ;;  %v124_v27 = vand.u32 2147483648, %v117_v21  ;;  %vm123_vm2 = vcmp.eq.f32.partialorder %v117_v21, 0.0 }
 0x13b   :  { %v115_v22 = vpop.xlane.xlu1 %114 }
 0x13c   :  { %v118_v23 = vmul.f32 0.032258064, %v115_v22 }
 0x13e   :  { %4109 = vrsqrt.f32 %v118_v23  ;;  %vm128_vm3 = vcmp.eq.f32.partialorder %v118_v23, inf  ;;  %v131_v34 = vand.u32 2147483648, %v118_v23  ;;  %vm130_vm4 = vcmp.eq.f32.partialorder %v118_v23, 0.0 }
 0x144   :  { %v4108_v24 = vpop.eup %4107 }
 0x145   :  { %v120_v26 = vmul.f32 %v4108_v24, %v117_v21 }
 0x147   :  { %v122_v28 = vsel %vm121_vm1, %v117_v21, %v120_v26 }
 0x148   :  { %v4110_v29 = vpop.eup %4109  ;;  %v125_v31 = vsel %vm123_vm2, %v124_v27, %v122_v28 }
 0x149   :  { %v127_v32 = vmul.f32 %v4110_v29, %v118_v23  ;;  %v139_v33 = vadd.f32 1e-06, %v125_v31 }
 0x14b   :  { %v129_v35 = vsel %vm128_vm3, %v118_v23, %v127_v32  ;;  %4111 = vrcp.f32 %v139_v33 }
 0x14c   :  { %v132_v37 = vsel %vm130_vm4, %v131_v34, %v129_v35  ;;  %vm3502_vm4 = vcmask 523264  }
 0x14d   :  { %v140_v39 = vadd.f32 1e-06, %v132_v37 }
 0x14f   :  { %4113 = vrcp.f32 %v140_v39 }
 0x155   :  { %v4112_v45 = vpop.eup %4111 }
 0x156   :  { %v142_v46 = vmul.f32 %v4112_v45, %v137_v43 }
 0x158   :  { %v149_v48 = vadd.f32 %v148_v44, %v142_v46 }
 0x159   :  { %v4114_v49 = vpop.eup %4113 }
 0x15a   :  { %v144_v50 = vmul.f32 %v4114_v49, %v138_v47  ;;  %3791 = vmatprep.mubr.msk.f32.mxu1 %vm96_vm0, %v149_v48 }
 0x15c   :  { %v150_v51 = vadd.f32 %v148_v44, %v144_v50 }
 0x15e   :  { %3792 = vmatmul.mubr.msk.f32.vlgmr.msra.gmra.mrb[0].mxu1 %vm96_vm0, %v150_v51 }
 0x15f   :  { %3796 = vmatprep.mubr.msk.f32.mxu1 %vm4249_vm5, %v4248_v52 }
 0x231   :  { %v3793_v54 = vpop.f32.mrb[0].mxu1 }
 0x232   :  { %v231_v55 = vpop.f32.mrb[1].mxu1  ;;  %v4390_v57 = vadd.f32 %v3793_v54, %v158_v53 }
 0x233   :  { %v4384_v56 = vadd.f32 %v231_v55, %v158_v53 }
 0x235   :  { %246 = vrot.lane.b32.xlu1 %v4384_v56, %s4250_s3  ;;  %242 = vrot.lane.b32.xlu0 %v4384_v56, %s4251_s17 }
 0x239   :  { %250 = vrot.lane.b32.xlu1 %v4384_v56, %s4252_s18  ;;  %248 = vrot.lane.b32.xlu0 %v4390_v57, %s4250_s3 }
 0x23d   :  { %244 = vrot.lane.b32.xlu1 %v4390_v57, %s4251_s17  ;;  %254 = vrot.lane.b32.xlu0 %v4384_v56, %s4253_s19 }
 0x241   :  { %252 = vrot.lane.b32.xlu1 %v4390_v57, %s4252_s18 }
 0x2a7   :  { %v4402_v58 = vpop.permute.xlu1 %246  ;;  %v4404_v59 = vpop.permute.xlu0 %242 }
 0x2a8   :  { %407 = vrot.lane.b32.xlu0 %v4402_v58, %s4253_s19  ;;  %331 = vrot.lane.b32.xlu1 %v4404_v59, %s4253_s19 }
 0x2ab   :  { %v4410_v60 = vpop.permute.xlu1 %250  ;;  %v4412_v61 = vpop.permute.xlu0 %248 }
 0x2ac   :  { %559 = vrot.lane.b32.xlu0 %v4390_v57, %s4253_s19  ;;  %483 = vrot.lane.b32.xlu1 %v4410_v60, %s4253_s19 }
 0x2af   :  { %v4418_v62 = vpop.permute.xlu1 %244  ;;  %v255_v63 = vpop.permute.xlu0 %254 }
 0x2b0   :  { %635 = vrot.lane.b32.xlu1 %v4418_v62, %s4253_s19  ;;  %711 = vrot.lane.b32.xlu0 %v4412_v61, %s4253_s19 }
 0x2b1   :  { %3795 = vmatpush3.xpose.msk.msra.mxu1 %vm256_vm6, %v255_v63 }
 0x2b2   :  { %3799 = vmatprep.subr.mxu1 %v4248_v52 }
 0x2b3   :  { %v4426_v2 = vpop.permute.xlu1 %252 }
 0x2b4   :  { %3797 = vmatmul.mubr.msk.f32.vlgmr.msra.gmra.mrb[2].mxu1 %vm256_vm6, %v4384_v56  ;;  %787 = vrot.lane.b32.xlu1 %v4426_v2, %s4253_s19 }
 0x2b5   :  { %3801 = vmatprep.mubr.msk.f32.mxu1 %vm4249_vm5, %v4248_v52 }
 0x31a   :  { %v332_v3 = vpop.permute.xlu1 %331  ;;  %v408_v4 = vpop.permute.xlu0 %407 }
 0x31b   :  { %3800 = vmatpush3.xpose.msk.msra.mxu1 %vm256_vm6, %v332_v3  ;;  %3805 = vmatpush3.xpose.msk.msra.mxu0 %vm256_vm6, %v408_v4 }
 0x31c   :  { %3809 = vmatprep.subr.mxu1 %v4248_v52  ;;  %3814 = vmatprep.subr.mxu0 %v4248_v52 }
 0x31e   :  { %v484_v5 = vpop.permute.xlu1 %483  ;;  %3802 = vmatmul.mubr.msk.f32.vlgmr.msra.gmra.mrb[4].mxu1 %vm256_vm6, %v4404_v59  ;;  %3807 = vmatmul.mubr.msk.f32.vlgmr.msra.gmra.mrb[0].mxu0 %vm256_vm6, %v4402_v58  ;;  %v560_v6 = vpop.permute.xlu0 %559 }
 0x31f   :  { %3810 = vmatpush3.xpose.msk.msra.mxu1 %vm256_vm6, %v484_v5  ;;  %3815 = vmatpush3.xpose.msk.msra.mxu0 %vm256_vm6, %v560_v6 }
 0x320   :  { %3811 = vmatprep.mubr.msk.f32.mxu1 %vm4249_vm5, %v4248_v52  ;;  %3816 = vmatprep.mubr.msk.f32.mxu0 %vm4249_vm5, %v4248_v52 }
 0x321   :  { %3819 = vmatprep.subr.mxu1 %v4248_v52  ;;  %3824 = vmatprep.subr.mxu0 %v4248_v52 }
 0x322   :  { %v636_v7 = vpop.permute.xlu1 %635  ;;  %3812 = vmatmul.mubr.msk.f32.vlgmr.msra.gmra.mrb[6].mxu1 %vm256_vm6, %v4410_v60  ;;  %3817 = vmatmul.mubr.msk.f32.vlgmr.msra.gmra.mrb[2].mxu0 %vm256_vm6, %v4390_v57  ;;  %v712_v8 = vpop.permute.xlu0 %711 }
 0x323   :  { %3820 = vmatpush3.xpose.msk.msra.mxu1 %vm256_vm6, %v636_v7  ;;  %3825 = vmatpush3.xpose.msk.msra.mxu0 %vm256_vm6, %v712_v8 }
 0x324   :  { %3821 = vmatprep.mubr.msk.f32.mxu1 %vm4249_vm5, %v4248_v52  ;;  %3826 = vmatprep.mubr.msk.f32.mxu0 %vm4249_vm5, %v4248_v52 }
 0x325   :  { %3829 = vmatprep.subr.mxu1 %v4248_v52  ;;  %3834 = vmatprep.subr.mxu0 %v4248_v52 }
 0x326   :  { %v788_v9 = vpop.permute.xlu1 %787  ;;  %3822 = vmatmul.mubr.msk.f32.vlgmr.msra.gmra.mrb[8].mxu1 %vm256_vm6, %v4418_v62  ;;  %3827 = vmatmul.mubr.msk.f32.vlgmr.msra.gmra.mrb[4].mxu0 %vm256_vm6, %v4412_v61 }
 0x327   :  { %3830 = vmatpush3.xpose.msk.msra.mxu1 %vm256_vm6, %v788_v9  ;;  %3831 = vmatprep.mubr.msk.f32.mxu1 %vm4249_vm5, %v4248_v52 }
 0x328   :  { %3839 = vmatprep.subr.mxu1 %v4248_v52  ;;  %3836 = vmatprep.mubr.msk.f32.mxu0 %vm4249_vm5, %v4248_v52 }
 0x32a   :  { %3832 = vmatmul.mubr.msk.f32.vlgmr.msra.gmra.mrb[10].mxu1 %vm256_vm6, %v4426_v2 }
 0x32b   :  { %3841 = vmatprep.mubr.msk.f32.mxu1 %vm4249_vm5, %v4248_v52 }
 0x387   :  { %v327_v13 = vpop.f32.mrb[2].mxu1 }
 0x388   :  { %v328_v14 = vadd.f32 %v327_v13, %v69_v12  ;;  %v3798_v15 = vpop.f32.mrb[3].mxu1 }
 0x38a   :  { %v863_v16 = vsel %vm256_vm6, %v328_v14, -inf }
 0x38b   :  { %864 = vmax.xlane.f32.xlu0 %v863_v16 }
 0x3f1   :  { %v403_v17 = vpop.f32.mrb[4].mxu1  ;;  %v479_v18 = vpop.f32.mrb[0].mxu0 }
 0x3f2   :  { %v404_v19 = vadd.f32 %v403_v17, %v69_v12  ;;  %v480_v20 = vadd.f32 %v479_v18, %v69_v12  ;;  %v3803_v21 = vpop.f32.mrb[5].mxu1  ;;  %v3808_v22 = vpop.f32.mrb[1].mxu0 }
 0x3f4   :  { %v866_v23 = vsel %vm256_vm6, %v404_v19, -inf  ;;  %v869_v24 = vsel %vm256_vm6, %v480_v20, -inf }
 0x3f5   :  { %867 = vmax.xlane.f32.xlu1 %v866_v23  ;;  %v555_v25 = vpop.f32.mrb[6].mxu1  ;;  %870 = vmax.xlane.f32.xlu0 %v869_v24  ;;  %v631_v26 = vpop.f32.mrb[2].mxu0 }
 0x3f6   :  { %v556_v27 = vadd.f32 %v555_v25, %v69_v12  ;;  %v3813_v28 = vpop.f32.mrb[7].mxu1  ;;  %v3818_v29 = vpop.f32.mrb[3].mxu0  ;;  %v632_v31 = vadd.f32 %v631_v26, %v69_v12 }
 0x3f8   :  { %v872_v32 = vsel %vm256_vm6, %v556_v27, -inf  ;;  %v875_v43 = vsel %vm256_vm6, %v632_v31, -inf }
 0x3f9   :  { %v707_v33 = vpop.f32.mrb[8].mxu1  ;;  %873 = vmax.xlane.f32.xlu0 %v872_v32  ;;  %v783_v34 = vpop.f32.mrb[4].mxu0 }
 0x3fa   :  { %v708_v35 = vadd.f32 %v707_v33, %v69_v12  ;;  %v3823_v36 = vpop.f32.mrb[9].mxu1  ;;  %v3828_v37 = vpop.f32.mrb[5].mxu0  ;;  %v784_v39 = vadd.f32 %v783_v34, %v69_v12 }
 0x3fc   :  { %v878_v40 = vsel %vm256_vm6, %v708_v35, -inf  ;;  %v881_v48 = vsel %vm256_vm6, %v784_v39, -inf }
 0x3fd   :  { %879 = vmax.xlane.f32.xlu1 %v878_v40  ;;  %v859_v44 = vpop.f32.mrb[10].mxu1  ;;  %876 = vmax.xlane.f32.xlu0 %v875_v43 }
 0x3fe   :  { %v860_v45 = vadd.f32 %v859_v44, %v69_v12  ;;  %v3833_v46 = vpop.f32.mrb[11].mxu1 }
 0x400   :  { %v884_v47 = vsel %vm256_vm6, %v860_v45, -inf }
 0x401   :  { %885 = vmax.xlane.f32.xlu1 %v884_v47  ;;  %882 = vmax.xlane.f32.xlu0 %v881_v48 }
 0x412   :  { %1027 = vrot.lane.b32.xlu1 %v4404_v59, %s4255_s20 }
 0x416   :  { %1103 = vrot.lane.b32.xlu1 %v4402_v58, %s4255_s20 }
 0x417   :  { %951 = vrot.lane.b32.xlu0 %v4384_v56, %s4255_s20 }
 0x418   :  { %v865_v49 = vpop.xlane.xlu0 %864 }
 0x419   :  { %v887_v50 = vsub.f32 %v328_v14, %v865_v49 }
 0x41a   :  { %1179 = vrot.lane.b32.xlu1 %v4410_v60, %s4255_s20 }
 0x41b   :  { %1255 = vrot.lane.b32.xlu0 %v4390_v57, %s4255_s20  ;;  %v895_v51 = vmul.f32 1.442695, %v887_v50 }
 0x41d   :  { %4115 = vpow2.f32 %v895_v51 }
 0x41e   :  { %1331 = vrot.lane.b32.xlu1 %v4418_v62, %s4255_s20 }
 0x427   :  { %v4499_v53 = vpop.eup %4115 }
 0x428   :  { %v911_v54 = vsel %vm256_vm6, %v4499_v53, 0.0 }
 0x43a   :  { %912 = vadd.xlane.f32.xlu0 %v911_v54 }
 0x482   :  { %v868_v55 = vpop.xlane.xlu1 %867  ;;  %v871_v56 = vpop.xlane.xlu0 %870 }
 0x483   :  { %v888_v58 = vsub.f32 %v404_v19, %v868_v55  ;;  %v889_v59 = vsub.f32 %v480_v20, %v871_v56 }
 0x485   :  { %v897_v60 = vmul.f32 1.442695, %v888_v58  ;;  %v899_v63 = vmul.f32 1.442695, %v889_v59 }
 0x486   :  { %v874_v57 = vpop.xlane.xlu0 %873 }
 0x487   :  { %4117 = vpow2.f32 %v897_v60  ;;  %v890_v3 = vsub.f32 %v556_v27, %v874_v57 }
 0x488   :  { %4119 = vpow2.f32 %v899_v63 }
 0x489   :  { %v901_v62 = vmul.f32 1.442695, %v890_v3 }
 0x48a   :  { %v880_v4 = vpop.xlane.xlu1 %879  ;;  %v877_v5 = vpop.xlane.xlu0 %876 }
 0x48b   :  { %4121 = vpow2.f32 %v901_v62  ;;  %v892_v6 = vsub.f32 %v708_v35, %v880_v4  ;;  %v891_v7 = vsub.f32 %v632_v31, %v877_v5 }
 0x48d   :  { %v905_v8 = vmul.f32 1.442695, %v892_v6  ;;  %v903_v9 = vmul.f32 1.442695, %v891_v7 }
 0x48e   :  { %v886_v10 = vpop.xlane.xlu1 %885  ;;  %v883_v12 = vpop.xlane.xlu0 %882 }
 0x48f   :  { %4123 = vpow2.f32 %v905_v8  ;;  %v894_v13 = vsub.f32 %v860_v45, %v886_v10  ;;  %v893_v14 = vsub.f32 %v784_v39, %v883_v12  ;;  %v56_v8 = vld [vmem:[%s4925_s6] sm:$0xff] }
 0x490   :  { %4125 = vpow2.f32 %v903_v9  ;;  %v57_v9 = vld [vmem:[%s4925_s6 + $0x8] sm:$0xff] }
 0x491   :  { %v4118_v15 = vpop.eup %4117  ;;  %v909_v16 = vmul.f32 1.442695, %v894_v13  ;;  %v907_v17 = vmul.f32 1.442695, %v893_v14  ;;  %v4036_v10 = vpack.c.bf16 %v57_v9, %v56_v8  ;;  %v58_v13 = vld [vmem:[%s4925_s6 + $0x10] sm:$0xff]  ;;  %v59_v14 = vld [vmem:[%s4925_s6 + $0x18] sm:$0xff] }
 0x492   :  { %v4120_v18 = vpop.eup %4119  ;;  %v1028_v19 = vpop.permute.xlu1 %1027  ;;  %v914_v21 = vsel %vm256_vm6, %v4118_v15, 0.0  ;;  %v52_v8 = vld [vmem:[%s4920_s1] sm:$0xff]  ;;  %v53_v9 = vld [vmem:[%s4920_s1 + $0x8] sm:$0xff] }
 0x493   :  { %v952_v20 = vpop.permute.xlu0 %951  ;;  %4127 = vpow2.f32 %v909_v16  ;;  %915 = vadd.xlane.f32.xlu1 %v914_v21  ;;  %3840 = vmatpush3.msra.mxu1 %v1028_v19  ;;  %v917_v22 = vsel %vm256_vm6, %v4120_v18, 0.0 }
 0x494   :  { %4129 = vpow2.f32 %v907_v17  ;;  %918 = vadd.xlane.f32.xlu0 %v917_v22  ;;  %3835 = vmatpush3.msra.mxu0 %v952_v20  ;;  %v4040_v17 = vpack.c.bf16 %v59_v14, %v58_v13  ;;  %v1732_v13 = vld [vmem:[%s4923_s4 + $0x10] sm:$0xff]  ;;  %v1733_v14 = vld [vmem:[%s4923_s4 + $0x18] sm:$0xff] }
 0x495   :  { %v4122_v23 = vpop.eup %4121  ;;  %3844 = vmatprep.subr.mxu0 %v4248_v52  ;;  %3849 = vmatprep.subr.mxu1 %v4248_v52 }
 0x496   :  { %v920_v24 = vsel %vm256_vm6, %v4122_v23, 0.0  ;;  %v1104_v39 = vpop.permute.xlu1 %1103 }
 0x497   :  { %921 = vadd.xlane.f32.xlu1 %v920_v24  ;;  %v1256_v34 = vpop.permute.xlu0 %1255 }
 0x499   :  { %v4124_v25 = vpop.eup %4123 }
 0x49a   :  { %v4126_v26 = vpop.eup %4125  ;;  %v926_v27 = vsel %vm256_vm6, %v4124_v25, 0.0  ;;  %v1180_v40 = vpop.permute.xlu1 %1179 }
 0x49b   :  { %927 = vadd.xlane.f32.xlu1 %v926_v27  ;;  %v923_v28 = vsel %vm256_vm6, %v4126_v26, 0.0 }
 0x49c   :  { %924 = vadd.xlane.f32.xlu0 %v923_v28 }
 0x49d   :  { %v4510_v29 = vpop.eup %4127 }
 0x49e   :  { %v4512_v31 = vpop.eup %4129  ;;  %v932_v32 = vsel %vm256_vm6, %v4510_v29, 0.0 }
 0x49f   :  { %933 = vadd.xlane.f32.xlu1 %v932_v32  ;;  %v929_v33 = vsel %vm256_vm6, %v4512_v31, 0.0 }
 0x4a0   :  { %930 = vadd.xlane.f32.xlu0 %v929_v33 }
 0x4b0   :  { %1483 = vrot.lane.b32.xlu1 %v4426_v2, %s4255_s20  ;;  %v1332_v2 = vpop.permute.xlu1 %1331 }
 0x4b6   :  { %1407 = vrot.lane.b32.xlu0 %v4412_v61, %s4255_s20 }
 0x4c7   :  { %v913_v35 = vpop.xlane.xlu0 %912 }
 0x4c8   :  { %4131 = vrcp.f32 %v913_v35 }
 0x4d2   :  { %v4132_v36 = vpop.eup %4131 }
 0x4d3   :  { %v943_v37 = vmul.f32 %v4132_v36, %v4499_v53 }
 0x4d5   :  { %3837 = vmatmul.mubr.msk.f32.vlgmr.msra.gmra.mrb[6].mxu0 %vm256_vm6, %v943_v37 }
 0x4d6   :  { %3845 = vmatpush3.msra.mxu0 %v1104_v39  ;;  %3846 = vmatprep.mubr.msk.f32.mxu0 %vm4249_vm5, %v4248_v52 }
 0x4d7   :  { %3854 = vmatprep.subr.mxu0 %v4248_v52 }
 0x520   :  { %v916_v43 = vpop.xlane.xlu1 %915 }
 0x521   :  { %4133 = vrcp.f32 %v916_v43  ;;  %v919_v61 = vpop.xlane.xlu0 %918 }
 0x522   :  { %4135 = vrcp.f32 %v919_v61  ;;  %v1593_v61 = vsub.s32 3, %v4361_v30 }
 0x524   :  { %v922_v44 = vpop.xlane.xlu1 %921 }
 0x525   :  { %4137 = vrcp.f32 %v922_v44  ;;  %v1594_v44 = vrot.slane %v4364_v38, %v1593_v61 }
 0x528   :  { %v928_v45 = vpop.xlane.xlu1 %927 }
 0x529   :  { %4139 = vrcp.f32 %v928_v45  ;;  %v925_v46 = vpop.xlane.xlu0 %924 }
 0x52a   :  { %4141 = vrcp.f32 %v925_v46 }
 0x52b   :  { %v4134_v47 = vpop.eup %4133 }
 0x52c   :  { %v4136_v48 = vpop.eup %4135  ;;  %v944_v49 = vmul.f32 %v4134_v47, %v4118_v15  ;;  %v934_v50 = vpop.xlane.xlu1 %933 }
 0x52d   :  { %v945_v51 = vmul.f32 %v4136_v48, %v4120_v18  ;;  %4143 = vrcp.f32 %v934_v50  ;;  %v931_v53 = vpop.xlane.xlu0 %930 }
 0x52e   :  { %4145 = vrcp.f32 %v931_v53  ;;  %3842 = vmatmul.mubr.msk.f32.vlgmr.msra.gmra.mrb[12].mxu1 %vm256_vm6, %v944_v49 }
 0x52f   :  { %v4138_v54 = vpop.eup %4137  ;;  %3847 = vmatmul.mubr.msk.f32.vlgmr.msra.gmra.mrb[8].mxu0 %vm256_vm6, %v945_v51  ;;  %3850 = vmatpush3.msra.mxu1 %v1180_v40 }
 0x530   :  { %v946_v55 = vmul.f32 %v4138_v54, %v4122_v23  ;;  %3855 = vmatpush3.msra.mxu0 %v1256_v34  ;;  %3851 = vmatprep.mubr.msk.f32.mxu1 %vm4249_vm5, %v4248_v52  ;;  %v1484_v63 = vpop.permute.xlu1 %1483 }
 0x531   :  { %3859 = vmatprep.subr.mxu1 %v4248_v52  ;;  %3856 = vmatprep.mubr.msk.f32.mxu0 %vm4249_vm5, %v4248_v52  ;;  %v1408_v3 = vpop.permute.xlu0 %1407 }
 0x532   :  { %3852 = vmatmul.mubr.msk.f32.vlgmr.msra.gmra.mrb[14].mxu1 %vm256_vm6, %v946_v55  ;;  %3864 = vmatprep.subr.mxu0 %v4248_v52 }
 0x533   :  { %v4140_v56 = vpop.eup %4139  ;;  %3860 = vmatpush3.msra.mxu1 %v1332_v2  ;;  %3861 = vmatprep.mubr.msk.f32.mxu1 %vm4249_vm5, %v4248_v52 }
 0x534   :  { %v4142_v58 = vpop.eup %4141  ;;  %v948_v59 = vmul.f32 %v4140_v56, %v4124_v25  ;;  %3869 = vmatprep.subr.mxu1 %v4248_v52 }
 0x535   :  { %v947_v60 = vmul.f32 %v4142_v58, %v4126_v26 }
 0x536   :  { %3862 = vmatmul.mubr.msk.f32.vlgmr.msra.gmra.mrb[16].mxu1 %vm256_vm6, %v948_v59 }
 0x537   :  { %v4144_v57 = vpop.eup %4143  ;;  %3857 = vmatmul.mubr.msk.f32.vlgmr.msra.gmra.mrb[10].mxu0 %vm256_vm6, %v947_v60  ;;  %3870 = vmatpush3.msra.mxu1 %v1484_v63 }
 0x538   :  { %v4146_v62 = vpop.eup %4145  ;;  %v950_v4 = vmul.f32 %v4144_v57, %v4510_v29  ;;  %3865 = vmatpush3.msra.mxu0 %v1408_v3  ;;  %3866 = vmatprep.mubr.msk.f32.mxu0 %vm4249_vm5, %v4248_v52  ;;  %v1819_v3 = vld [vmem:[%s4924_s5] sm:$0xff] }
 0x539   :  { %v949_v5 = vmul.f32 %v4146_v62, %v4512_v31  ;;  %3871 = vmatprep.mubr.msk.f32.mxu1 %vm4249_vm5, %v4248_v52  ;;  %4037 = vmatprep.subr.bf16.mxu0 %v4036_v10  ;;  %v1820_v62 = vld [vmem:[%s4924_s5 + $0x8] sm:$0xff] }
 0x53a   :  { %3872 = vmatmul.mubr.msk.f32.vlgmr.msra.gmra.mrb[18].mxu1 %vm256_vm6, %v950_v4  ;;  %v4052_v4 = vpack.c.bf16 %v1820_v62, %v1819_v3 }
 0x53b   :  { %3867 = vmatmul.mubr.msk.f32.vlgmr.msra.gmra.mrb[12].mxu0 %vm256_vm6, %v949_v5  ;;  %v1821_v5 = vld [vmem:[%s4924_s5 + $0x10] sm:$0xff] }
 0x53c   :  { %4039 = vmatpush3.bf16.msra.mxu0 %v4036_v10  ;;  %v1730_v10 = vld [vmem:[%s4923_s4] sm:$0xff] }
 0x53d   :  { %4041 = vmatprep.subr.bf16.mxu0 %v4040_v17 }
 0x540   :  { %4043 = vmatpush3.bf16.msra.mxu0 %v4040_v17 }
 0x541   :  { %4053 = vmatprep.subr.bf16.mxu0 %v4052_v4 }
 0x5a8   :  { %v1023_v6 = vpop.f32.mrb[6].mxu0 }
 0x5a9   :  { %v3838_v7 = vpop.f32.mrb[7].mxu0 }
 0x601   :  { %v1099_v12 = vpop.f32.mrb[12].mxu1 }
 0x602   :  { %v1175_v15 = vpop.f32.mrb[8].mxu0  ;;  %v3843_v16 = vpop.f32.mrb[13].mxu1  ;;  %1561 = vrot.lane.b32.xlu0 %v1099_v12, %s4247_s24  ;;  %v1731_v12 = vld [vmem:[%s4923_s4 + $0x8] sm:$0xff] }
 0x603   :  { %v3848_v18 = vpop.f32.mrb[9].mxu0  ;;  %v4048_v16 = vpack.c.bf16 %v1733_v14, %v1732_v13 }
 0x605   :  { %v1251_v19 = vpop.f32.mrb[14].mxu1 }
 0x606   :  { %v3853_v20 = vpop.f32.mrb[15].mxu1  ;;  %1569 = vrot.lane.b32.xlu0 %v1175_v15, %s4256_s0  ;;  %v4044_v15 = vpack.c.bf16 %v1731_v12, %v1730_v10  ;;  %v70_v12 = vld [vmem:[%s4921_s2] sm:$0x3] }
 0x607   :  { %vm71_vm14 = vcmp.gt.f32.partialorder %v70_v12, 0.5 }
 0x608   :  { %4045 = vmatprep.subr.bf16.mxu1 %v4044_v15 }
 0x609   :  { %v1403_v21 = vpop.f32.mrb[16].mxu1  ;;  %4047 = vmatpush3.bf16.msra.mxu1 %v4044_v15  ;;  %v72_v15 = vsel %vm71_vm14, 0.0, %v4254_v11 }
 0x60a   :  { %v1327_v22 = vpop.f32.mrb[10].mxu0  ;;  %1563 = vrot.lane.b32.xlu1 %v1403_v21, %s4247_s24  ;;  %v3863_v23 = vpop.f32.mrb[17].mxu1  ;;  %1577 = vrot.lane.b32.xlu0 %v1251_v19, %s4257_s9 }
 0x60b   :  { %v3858_v24 = vpop.f32.mrb[11].mxu0  ;;  %4049 = vmatprep.subr.bf16.mxu1 %v4048_v16 }
 0x60d   :  { %v1555_v25 = vpop.f32.mrb[18].mxu1  ;;  %4051 = vmatpush3.bf16.msra.mxu1 %v4048_v16 }
 0x60e   :  { %v1479_v26 = vpop.f32.mrb[12].mxu0  ;;  %v3873_v27 = vpop.f32.mrb[19].mxu1  ;;  %3907 = vmatprep.subr.mxu1 %v4248_v52 }
 0x60f   :  { %1571 = vrot.lane.b32.xlu1 %v1479_v26, %s4256_s0  ;;  %v3868_v28 = vpop.f32.mrb[13].mxu0 }
 0x613   :  { %1579 = vrot.lane.b32.xlu1 %v1555_v25, %s4257_s9 }
 0x674   :  { %v1562_v29 = vpop.permute.xlu0 %1561 }
 0x675   :  { %v1583_v32 = vsel %vm256_vm6, %v1023_v6, %v1562_v29  ;;  %v1822_v6 = vld [vmem:[%s4924_s5 + $0x18] sm:$0xff] }
 0x676   :  { %v4056_v7 = vpack.c.bf16 %v1822_v6, %v1821_v5 }
 0x678   :  { %v1570_v31 = vpop.permute.xlu0 %1569 }
 0x679   :  { %v1586_v33 = vsel %vm1585_vm8, %v1583_v32, %v1570_v31  ;;  %v1714_v32 = vsub.s32 1, %v4361_v30 }
 0x67c   :  { %v1564_v34 = vpop.permute.xlu1 %1563  ;;  %v1578_v35 = vpop.permute.xlu0 %1577 }
 0x67d   :  { %v1589_v36 = vsel %vm1588_vm9, %v1586_v33, %v1578_v35  ;;  %v1584_v39 = vsel %vm256_vm6, %v1327_v22, %v1564_v34  ;;  %v1715_v35 = vrot.slane %v4370_v42, %v1714_v32 }
 0x67e   :  { %3882 = vmatprep.mubr.msk.f32.mxu0 %vm96_vm0, %v1589_v36  ;;  %v1726_v36 = vsub.s32 2, %v4361_v30 }
 0x681   :  { %v1572_v37 = vpop.permute.xlu1 %1571 }
 0x682   :  { %v1587_v40 = vsel %vm1585_vm8, %v1584_v39, %v1572_v37  ;;  %v1727_v39 = vrot.slane %v4370_v42, %v1726_v36 }
 0x685   :  { %v1580_v2 = vpop.permute.xlu1 %1579 }
 0x686   :  { %v1590_v43 = vsel %vm1588_vm9, %v1587_v40, %v1580_v2 }
 0x687   :  { %3883 = vmatmul.mubr.msk.f32.vlgmr.msra.gmra.mrb[14].mxu0 %vm96_vm0, %v1590_v43 }
 0x688   :  { %4055 = vmatpush3.bf16.msra.mxu0 %v4052_v4  ;;  %3904 = vmatprep.mubr.msk.f32.mxu0 %vm96_vm0, %v52_v8 }
 0x689   :  { %4057 = vmatprep.subr.bf16.mxu0 %v4056_v7 }
 0x68c   :  { %4059 = vmatpush3.bf16.msra.mxu0 %v4056_v7 }
 0x68d   :  { %3917 = vmatprep.subr.mxu0 %v4248_v52 }
 0x68f   :  { %3905 = vmatmul.mubr.msk.f32.vlgmr.msra.gmra.mrb[16].mxu0 %vm96_vm0, %v53_v9  ;;  %v4258_v9 = vmov 1966171168  }
 0x690   :  { %3919 = vmatprep.mubr.msk.f32.mxu0 %vm4249_vm5, %v4248_v52  ;;  %v75_v10 = vunpack.c.l.s4 %v4258_v9 }
 0x692   :  { %v76_v13 = vunpack.c.0.s8 %v75_v10 }
 0x694   :  { %v79_v14 = vsub.s32 %v76_v13, %v4361_v30 }
 0x696   :  { %v80_v16 = vrot.slane %v72_v15, %v79_v14 }
 0x75a   :  { %v3884_v45 = vpop.f32.mrb[14].mxu0 }
 0x75b   :  { %v1673_v46 = vadd.f32 %v3884_v45, %v1594_v44  ;;  %v1667_v47 = vpop.f32.mrb[15].mxu0 }
 0x75c   :  { %v1668_v48 = vadd.f32 %v1667_v47, %v1594_v44 }
 0x75d   :  { %v4580_v49 = vadd.f32 %v1673_v46, %v4338_v1 }
 0x75e   :  { %v4583_v50 = vadd.f32 %v1668_v48, %v4333_v0  ;;  %v1826_v48 = vrot.slane %v4364_v38, %v1726_v36 }
 0x75f   :  { %v1681_v51 = vsel %vm96_vm0, %v4580_v49, 0.0 }
 0x760   :  { %1682 = vadd.xlane.f32.xlu1 %v1681_v51  ;;  %v1678_v53 = vsel %vm96_vm0, %v4583_v50, 0.0 }
 0x761   :  { %1679 = vadd.xlane.f32.xlu0 %v1678_v53 }
 0x762   :  { %v3906_v51 = vpop.f32.mrb[16].mxu0 }
 0x763   :  { %v4643_v53 = vadd.f32 %v3906_v51, %v1826_v48  ;;  %v1899_v42 = vpop.f32.mrb[17].mxu0 }
 0x7ed   :  { %v1683_v54 = vpop.xlane.xlu1 %1682 }
 0x7ee   :  { %v1685_v55 = vmul.f32 0.03125, %v1683_v54  ;;  %v1680_v56 = vpop.xlane.xlu0 %1679  ;;  %v4645_v54 = vadd.f32 %v1899_v42, %v1826_v48 }
 0x7ef   :  { %v1684_v58 = vmul.f32 0.03125, %v1680_v56  ;;  %v1737_v56 = vrot.slane %v4364_v38, %v1714_v32 }
 0x7f0   :  { %v4590_v59 = vsub.f32 %v4580_v49, %v1685_v55  ;;  %1928 = vrot.lane.b32.xlu1 %v4645_v54, %s4250_s3 }
 0x7f1   :  { %v1686_v1 = vsub.f32 %v4583_v50, %v1684_v58 }
 0x7f2   :  { %v1689_v63 = vmul.f32 %v4590_v59, %v4590_v59  ;;  %v1717_v43 = vmul.f32 %v1715_v35, %v4590_v59 }
 0x7f3   :  { %v1688_v60 = vmul.f32 %v1686_v1, %v1686_v1  ;;  %v1716_v37 = vmul.f32 %v1715_v35, %v1686_v1 }
 0x7f4   :  { %v1693_v57 = vsel %vm96_vm0, %v1689_v63, 0.0  ;;  %1932 = vrot.lane.b32.xlu1 %v4645_v54, %s4252_s18 }
 0x7f5   :  { %v1690_v0 = vsel %vm96_vm0, %v1688_v60, 0.0 }
 0x7f6   :  { %1691 = vadd.xlane.f32.xlu0 %v1690_v0 }
 0x7fa   :  { %1694 = vadd.xlane.f32.xlu0 %v1693_v57 }
 0x810   :  { %1924 = vrot.lane.b32.xlu0 %v4645_v54, %s4251_s17 }
 0x814   :  { %1926 = vrot.lane.b32.xlu0 %v4643_v53, %s4251_s17 }
 0x862   :  { %v4658_v55 = vpop.permute.xlu1 %1928 }
 0x863   :  { %3918 = vmatpush3.xpose.msk.msra.mxu0 %vm256_vm6, %v4658_v55 }
 0x864   :  { %3927 = vmatprep.subr.mxu0 %v4248_v52 }
 0x866   :  { %v4682_v38 = vpop.permute.xlu1 %1932 }
 0x883   :  { %v1692_v17 = vpop.xlane.xlu0 %1691 }
 0x884   :  { %v1696_v18 = vmul.f32 0.032258064, %v1692_v17  ;;  %v88_v17 = vrot.slane %v80_v16, %v79_v14 }
 0x886   :  { %4147 = vrsqrt.f32 %v1696_v18  ;;  %vm1700_vm10 = vcmp.eq.f32.partialorder %v1696_v18, inf  ;;  %v1703_v23 = vand.u32 2147483648, %v1696_v18  ;;  %vm1702_vm11 = vcmp.eq.f32.partialorder %v1696_v18, 0.0 }
 0x887   :  { %v1695_v19 = vpop.xlane.xlu0 %1694 }
 0x888   :  { %v1697_v20 = vmul.f32 0.032258064, %v1695_v19 }
 0x88a   :  { %4149 = vrsqrt.f32 %v1697_v20  ;;  %vm1707_vm12 = vcmp.eq.f32.partialorder %v1697_v20, inf  ;;  %v1710_v29 = vand.u32 2147483648, %v1697_v20  ;;  %vm1709_vm13 = vcmp.eq.f32.partialorder %v1697_v20, 0.0 }
 0x88b   :  { %v4667_v0 = vpop.permute.xlu0 %1924 }
 0x88f   :  { %v4684_v63 = vpop.permute.xlu0 %1926 }
 0x890   :  { %v4148_v21 = vpop.eup %4147 }
 0x891   :  { %v1699_v22 = vmul.f32 %v4148_v21, %v1696_v18 }
 0x893   :  { %v1701_v24 = vsel %vm1700_vm10, %v1696_v18, %v1699_v22  ;;  %v1939_v18 = vrot.slane %v88_v17, %v4368_v41 }
 0x894   :  { %v4150_v25 = vpop.eup %4149  ;;  %v1704_v26 = vsel %vm1702_vm11, %v1703_v23, %v1701_v24  ;;  %v81_v23 = vcombine.high %v80_v16, %v80_v16 }
 0x895   :  { %v1706_v27 = vmul.f32 %v4150_v25, %v1697_v20  ;;  %v1718_v28 = vadd.f32 1e-06, %v1704_v26 }
 0x897   :  { %v1708_v31 = vsel %vm1707_vm12, %v1697_v20, %v1706_v27  ;;  %4151 = vrcp.f32 %v1718_v28  ;;  %v95_v27 = vrot.slane %v81_v23, %v79_v14 }
 0x898   :  { %v1711_v33 = vsel %vm1709_vm13, %v1710_v29, %v1708_v31 }
 0x899   :  { %v1719_v34 = vadd.f32 1e-06, %v1711_v33 }
 0x89b   :  { %4153 = vrcp.f32 %v1719_v34  ;;  %v1943_v34 = vrot.slane %v95_v27, %v4368_v41 }
 0x8a1   :  { %v4152_v40 = vpop.eup %4151 }
 0x8a2   :  { %v1721_v2 = vmul.f32 %v4152_v40, %v1716_v37 }
 0x8a4   :  { %v1728_v44 = vadd.f32 %v1727_v39, %v1721_v2 }
 0x8a5   :  { %v4154_v45 = vpop.eup %4153 }
 0x8a6   :  { %v1723_v46 = vmul.f32 %v4154_v45, %v1717_v43  ;;  %3893 = vmatprep.mubr.msk.f32.mxu1 %vm96_vm0, %v1728_v44 }
 0x8a8   :  { %v1729_v47 = vadd.f32 %v1727_v39, %v1723_v46 }
 0x8aa   :  { %3894 = vmatmul.mubr.msk.f32.vlgmr.msra.gmra.mrb[20].mxu1 %vm96_vm0, %v1729_v47 }
 0x8ab   :  { %3909 = vmatprep.mubr.msk.f32.mxu1 %vm4249_vm5, %v4248_v52  ;;  %3908 = vmatpush3.xpose.msk.msra.mxu1 %vm256_vm6, %v4645_v54 }
 0x8ac   :  { %3912 = vmatprep.subr.mxu1 %v4248_v52 }
 0x97d   :  { %v3895_v58 = vpop.f32.mrb[20].mxu1 }
 0x97e   :  { %v1816_v59 = vadd.f32 %v3895_v58, %v1737_v56  ;;  %v1810_v1 = vpop.f32.mrb[21].mxu1 }
 0x97f   :  { %v1811_v60 = vadd.f32 %v1810_v1, %v1737_v56 }
 0x980   :  { %1912 = vrot.lane.b32.xlu1 %v1816_v59, %s4251_s17 }
 0x981   :  { %1914 = vrot.lane.b32.xlu0 %v1811_v60, %s4250_s3  ;;  %3910 = vmatmul.mubr.msk.f32.vlgmr.msra.gmra.mrb[22].mxu1 %vm256_vm6, %v1811_v60 }
 0x982   :  { %3913 = vmatpush3.xpose.msk.msra.mxu1 %vm256_vm6, %v4667_v0  ;;  %3914 = vmatprep.mubr.msk.f32.mxu1 %vm4249_vm5, %v4248_v52 }
 0x983   :  { %3922 = vmatprep.subr.mxu1 %v4248_v52 }
 0x984   :  { %1910 = vrot.lane.b32.xlu1 %v1811_v60, %s4251_s17 }
 0x985   :  { %1930 = vrot.lane.b32.xlu0 %v4643_v53, %s4250_s3 }
 0x988   :  { %1918 = vrot.lane.b32.xlu1 %v1811_v60, %s4252_s18 }
 0x989   :  { %1916 = vrot.lane.b32.xlu0 %v1816_v59, %s4250_s3 }
 0x98c   :  { %1934 = vrot.lane.b32.xlu1 %v4643_v53, %s4252_s18 }
 0x990   :  { %1920 = vrot.lane.b32.xlu1 %v1816_v59, %s4252_s18 }
 0x9f2   :  { %v1913_v57 = vpop.permute.xlu1 %1912 }
 0x9f3   :  { %v1915_v3 = vpop.permute.xlu0 %1914 }
 0x9f4   :  { %3920 = vmatmul.mubr.msk.f32.vlgmr.msra.gmra.mrb[18].mxu0 %vm256_vm6, %v1915_v3 }
 0x9f5   :  { %3928 = vmatpush3.xpose.msk.msra.mxu0 %vm256_vm6, %v4643_v53  ;;  %3929 = vmatprep.mubr.msk.f32.mxu0 %vm4249_vm5, %v4248_v52 }
 0x9f6   :  { %v1911_v62 = vpop.permute.xlu1 %1910  ;;  %3937 = vmatprep.subr.mxu0 %v4248_v52 }
 0x9f7   :  { %3915 = vmatmul.mubr.msk.f32.vlgmr.msra.gmra.mrb[24].mxu1 %vm256_vm6, %v1911_v62  ;;  %v4693_v4 = vpop.permute.xlu0 %1930 }
 0x9f8   :  { %3923 = vmatpush3.xpose.msk.msra.mxu1 %vm256_vm6, %v4682_v38  ;;  %3930 = vmatmul.mubr.msk.f32.vlgmr.msra.gmra.mrb[20].mxu0 %vm256_vm6, %v1816_v59 }
 0x9f9   :  { %3938 = vmatpush3.xpose.msk.msra.mxu0 %vm256_vm6, %v4693_v4  ;;  %3924 = vmatprep.mubr.msk.f32.mxu1 %vm4249_vm5, %v4248_v52 }
 0x9fa   :  { %v1919_v5 = vpop.permute.xlu1 %1918  ;;  %3932 = vmatprep.subr.mxu1 %v4248_v52  ;;  %3939 = vmatprep.mubr.msk.f32.mxu0 %vm4249_vm5, %v4248_v52 }
 0x9fb   :  { %3925 = vmatmul.mubr.msk.f32.vlgmr.msra.gmra.mrb[26].mxu1 %vm256_vm6, %v1919_v5  ;;  %v1917_v6 = vpop.permute.xlu0 %1916  ;;  %3947 = vmatprep.subr.mxu0 %v4248_v52 }
 0x9fc   :  { %3933 = vmatpush3.xpose.msk.msra.mxu1 %vm256_vm6, %v4684_v63  ;;  %3940 = vmatmul.mubr.msk.f32.vlgmr.msra.gmra.mrb[22].mxu0 %vm256_vm6, %v1917_v6 }
 0x9fd   :  { %3934 = vmatprep.mubr.msk.f32.mxu1 %vm4249_vm5, %v4248_v52  ;;  %3942 = vmatprep.subr.mxu1 %v4248_v52 }
 0x9fe   :  { %v4713_v7 = vpop.permute.xlu1 %1934  ;;  %3949 = vmatprep.mubr.msk.f32.mxu0 %vm4249_vm5, %v4248_v52 }
 0x9ff   :  { %3935 = vmatmul.mubr.msk.f32.vlgmr.msra.gmra.mrb[28].mxu1 %vm256_vm6, %v1913_v57 }
 0xa00   :  { %3943 = vmatpush3.xpose.msk.msra.mxu1 %vm256_vm6, %v4713_v7  ;;  %3944 = vmatprep.mubr.msk.f32.mxu1 %vm4249_vm5, %v4248_v52 }
 0xa01   :  { %3952 = vmatprep.subr.mxu1 %v4248_v52 }
 0xa02   :  { %v1921_v8 = vpop.permute.xlu1 %1920 }
 0xa03   :  { %3945 = vmatmul.mubr.msk.f32.vlgmr.msra.gmra.mrb[30].mxu1 %vm256_vm6, %v1921_v8 }
 0xa04   :  { %3954 = vmatprep.mubr.msk.f32.mxu1 %vm4249_vm5, %v4248_v52 }
 0xa54   :  { %v2016_v19 = vpop.f32.mrb[22].mxu1 }
 0xa55   :  { %v2017_v20 = vadd.f32 %v2016_v19, %v1939_v18  ;;  %v3911_v21 = vpop.f32.mrb[23].mxu1 }
 0xa57   :  { %v2538_v22 = vsel %vm256_vm6, %v2017_v20, -inf }
 0xa58   :  { %2539 = vmax.xlane.f32.xlu0 %v2538_v22 }
 0xac7   :  { %v2164_v24 = vpop.f32.mrb[18].mxu0 }
 0xac8   :  { %v2165_v25 = vadd.f32 %v2164_v24, %v1939_v18  ;;  %v3921_v26 = vpop.f32.mrb[19].mxu0 }
 0xaca   :  { %v2090_v28 = vpop.f32.mrb[24].mxu1  ;;  %v2544_v29 = vsel %vm256_vm6, %v2165_v25, -inf }
 0xacb   :  { %v2091_v31 = vadd.f32 %v2090_v28, %v1939_v18  ;;  %v3916_v11 = vpop.f32.mrb[25].mxu1  ;;  %2545 = vmax.xlane.f32.xlu0 %v2544_v29  ;;  %v2312_v32 = vpop.f32.mrb[20].mxu0 }
 0xacc   :  { %v3931_v33 = vpop.f32.mrb[21].mxu0  ;;  %v2313_v43 = vadd.f32 %v2312_v32, %v1943_v34 }
 0xacd   :  { %v2541_v35 = vsel %vm256_vm6, %v2091_v31, -inf }
 0xace   :  { %2542 = vmax.xlane.f32.xlu1 %v2541_v35  ;;  %v2238_v36 = vpop.f32.mrb[26].mxu1  ;;  %v2550_v41 = vsel %vm256_vm6, %v2313_v43, -inf }
 0xacf   :  { %v2239_v37 = vadd.f32 %v2238_v36, %v1939_v18  ;;  %v3926_v39 = vpop.f32.mrb[27].mxu1  ;;  %v2460_v40 = vpop.f32.mrb[22].mxu0 }
 0xad0   :  { %v3941_v2 = vpop.f32.mrb[23].mxu0  ;;  %v2461_v48 = vadd.f32 %v2460_v40, %v1943_v34 }
 0xad1   :  { %v2547_v44 = vsel %vm256_vm6, %v2239_v37, -inf }
 0xad2   :  { %v2386_v45 = vpop.f32.mrb[28].mxu1  ;;  %2548 = vmax.xlane.f32.xlu0 %v2547_v44  ;;  %v2556_v1 = vsel %vm256_vm6, %v2461_v48, -inf }
 0xad3   :  { %v2387_v46 = vadd.f32 %v2386_v45, %v1943_v34  ;;  %v3936_v47 = vpop.f32.mrb[29].mxu1 }
 0xad5   :  { %v2553_v51 = vsel %vm256_vm6, %v2387_v46, -inf }
 0xad6   :  { %2554 = vmax.xlane.f32.xlu1 %v2553_v51  ;;  %v2534_v42 = vpop.f32.mrb[30].mxu1  ;;  %2551 = vmax.xlane.f32.xlu0 %v2550_v41 }
 0xad7   :  { %v2535_v56 = vadd.f32 %v2534_v42, %v1943_v34  ;;  %v3946_v58 = vpop.f32.mrb[31].mxu1 }
 0xad9   :  { %v2559_v59 = vsel %vm256_vm6, %v2535_v56, -inf }
 0xada   :  { %2560 = vmax.xlane.f32.xlu1 %v2559_v59  ;;  %2557 = vmax.xlane.f32.xlu0 %v2556_v1 }
 0xae5   :  { %v2540_v60 = vpop.xlane.xlu0 %2539 }
 0xae6   :  { %v2562_v57 = vsub.f32 %v2017_v20, %v2540_v60 }
 0xae8   :  { %v2570_v3 = vmul.f32 1.442695, %v2562_v57 }
 0xaea   :  { %4155 = vpow2.f32 %v2570_v3 }
 0xaeb   :  { %2702 = vrot.lane.b32.xlu1 %v4667_v0, %s4253_s19 }
 0xaef   :  { %2778 = vrot.lane.b32.xlu1 %v4658_v55, %s4253_s19 }
 0xaf0   :  { %2626 = vrot.lane.b32.xlu0 %v4645_v54, %s4253_s19 }
 0xaf3   :  { %2854 = vrot.lane.b32.xlu1 %v4682_v38, %s4253_s19 }
 0xaf4   :  { %2930 = vrot.lane.b32.xlu0 %v4643_v53, %s4253_s19  ;;  %v4753_v0 = vpop.eup %4155 }
 0xaf5   :  { %v2586_v55 = vsel %vm256_vm6, %v4753_v0, 0.0 }
 0xaf7   :  { %3006 = vrot.lane.b32.xlu1 %v4684_v63, %s4253_s19 }
 0xb13   :  { %2587 = vadd.xlane.f32.xlu0 %v2586_v55 }
 0xb58   :  { %v2546_v54 = vpop.xlane.xlu0 %2545 }
 0xb59   :  { %v2564_v62 = vsub.f32 %v2165_v25, %v2546_v54 }
 0xb5b   :  { %v2574_v5 = vmul.f32 1.442695, %v2564_v62  ;;  %v2543_v38 = vpop.xlane.xlu1 %2542 }
 0xb5c   :  { %v2563_v6 = vsub.f32 %v2091_v31, %v2543_v38 }
 0xb5d   :  { %4157 = vpow2.f32 %v2574_v5 }
 0xb5e   :  { %v2572_v53 = vmul.f32 1.442695, %v2563_v6 }
 0xb5f   :  { %v2549_v8 = vpop.xlane.xlu0 %2548 }
 0xb60   :  { %4159 = vpow2.f32 %v2572_v53  ;;  %v2565_v63 = vsub.f32 %v2239_v37, %v2549_v8 }
 0xb62   :  { %v2576_v9 = vmul.f32 1.442695, %v2565_v63 }
 0xb63   :  { %v2555_v10 = vpop.xlane.xlu1 %2554  ;;  %v2552_v12 = vpop.xlane.xlu0 %2551 }
 0xb64   :  { %4161 = vpow2.f32 %v2576_v9  ;;  %v2567_v13 = vsub.f32 %v2387_v46, %v2555_v10  ;;  %v2566_v14 = vsub.f32 %v2313_v43, %v2552_v12  ;;  %v60_v12 = vld [vmem:[%s4925_s6 + $0x20] sm:$0xff] }
 0xb66   :  { %v2580_v15 = vmul.f32 1.442695, %v2567_v13  ;;  %v2578_v16 = vmul.f32 1.442695, %v2566_v14  ;;  %v61_v13 = vld [vmem:[%s4925_s6 + $0x28] sm:$0xff] }
 0xb67   :  { %v4158_v17 = vpop.eup %4157  ;;  %v2561_v18 = vpop.xlane.xlu1 %2560 }
 0xb68   :  { %v2558_v19 = vpop.xlane.xlu0 %2557  ;;  %4163 = vpow2.f32 %v2580_v15  ;;  %v2569_v20 = vsub.f32 %v2535_v56, %v2561_v18  ;;  %v2592_v22 = vsel %vm256_vm6, %v4158_v17, 0.0  ;;  %v4060_v15 = vpack.c.bf16 %v61_v13, %v60_v12  ;;  %v63_v18 = vld [vmem:[%s4925_s6 + $0x38] sm:$0xff] }
 0xb69   :  { %v2568_v21 = vsub.f32 %v2461_v48, %v2558_v19  ;;  %4165 = vpow2.f32 %v2578_v16  ;;  %2593 = vadd.xlane.f32.xlu0 %v2592_v22  ;;  %v3497_v13 = vld [vmem:[%s4927_s8 + $0x18] sm:$0xff] }
 0xb6a   :  { %v4160_v23 = vpop.eup %4159  ;;  %v2584_v24 = vmul.f32 1.442695, %v2569_v20 }
 0xb6b   :  { %v2582_v25 = vmul.f32 1.442695, %v2568_v21  ;;  %v2703_v26 = vpop.permute.xlu1 %2702  ;;  %v2589_v28 = vsel %vm256_vm6, %v4160_v23, 0.0 }
 0xb6c   :  { %v2627_v27 = vpop.permute.xlu0 %2626  ;;  %4167 = vpow2.f32 %v2584_v24  ;;  %2590 = vadd.xlane.f32.xlu1 %v2589_v28  ;;  %3953 = vmatpush3.msra.mxu1 %v2703_v26 }
 0xb6d   :  { %3948 = vmatpush3.msra.mxu0 %v2627_v27  ;;  %4169 = vpow2.f32 %v2582_v25  ;;  %3962 = vmatprep.subr.mxu1 %v4248_v52 }
 0xb6e   :  { %3957 = vmatprep.subr.mxu0 %v4248_v52  ;;  %v4162_v29 = vpop.eup %4161 }
 0xb6f   :  { %v2595_v31 = vsel %vm256_vm6, %v4162_v29, 0.0  ;;  %v2779_v45 = vpop.permute.xlu1 %2778 }
 0xb70   :  { %2596 = vadd.xlane.f32.xlu1 %v2595_v31  ;;  %v2931_v40 = vpop.permute.xlu0 %2930 }
 0xb72   :  { %v4164_v11 = vpop.eup %4163 }
 0xb73   :  { %v4166_v32 = vpop.eup %4165  ;;  %v2601_v33 = vsel %vm256_vm6, %v4164_v11, 0.0  ;;  %v2855_v46 = vpop.permute.xlu1 %2854 }
 0xb74   :  { %2602 = vadd.xlane.f32.xlu1 %v2601_v33  ;;  %v2598_v34 = vsel %vm256_vm6, %v4166_v32, 0.0 }
 0xb75   :  { %2599 = vadd.xlane.f32.xlu0 %v2598_v34 }
 0xb76   :  { %v4764_v35 = vpop.eup %4167 }
 0xb77   :  { %v4766_v36 = vpop.eup %4169  ;;  %v2607_v37 = vsel %vm256_vm6, %v4764_v35, 0.0 }
 0xb78   :  { %2608 = vadd.xlane.f32.xlu1 %v2607_v37  ;;  %v2604_v39 = vsel %vm256_vm6, %v4766_v36, 0.0 }
 0xb79   :  { %2605 = vadd.xlane.f32.xlu0 %v2604_v39 }
 0xb89   :  { %3158 = vrot.lane.b32.xlu1 %v4713_v7, %s4253_s19  ;;  %v3007_v7 = vpop.permute.xlu1 %3006 }
 0xb8f   :  { %3082 = vrot.lane.b32.xlu0 %v4693_v4, %s4253_s19 }
 0xba0   :  { %v2588_v2 = vpop.xlane.xlu0 %2587 }
 0xba1   :  { %4171 = vrcp.f32 %v2588_v2 }
 0xbab   :  { %v4172_v43 = vpop.eup %4171 }
 0xbac   :  { %v2618_v44 = vmul.f32 %v4172_v43, %v4753_v0 }
 0xbae   :  { %3950 = vmatmul.mubr.msk.f32.vlgmr.msra.gmra.mrb[24].mxu0 %vm256_vm6, %v2618_v44 }
 0xbaf   :  { %3958 = vmatpush3.msra.mxu0 %v2779_v45  ;;  %3959 = vmatprep.mubr.msk.f32.mxu0 %vm4249_vm5, %v4248_v52  ;;  %v3266_v45 = vsub.s32 4, %v4361_v30 }
 0xbb0   :  { %3967 = vmatprep.subr.mxu0 %v4248_v52 }
 0xbf6   :  { %v2594_v47 = vpop.xlane.xlu0 %2593 }
 0xbf7   :  { %4173 = vrcp.f32 %v2594_v47 }
 0xbf9   :  { %v2591_v4 = vpop.xlane.xlu1 %2590 }
 0xbfa   :  { %4175 = vrcp.f32 %v2591_v4 }
 0xbfd   :  { %v2597_v48 = vpop.xlane.xlu1 %2596 }
 0xbfe   :  { %4177 = vrcp.f32 %v2597_v48 }
 0xc01   :  { %v4174_v51 = vpop.eup %4173  ;;  %v2603_v41 = vpop.xlane.xlu1 %2602 }
 0xc02   :  { %v2620_v42 = vmul.f32 %v4174_v51, %v4158_v17  ;;  %4179 = vrcp.f32 %v2603_v41  ;;  %v2600_v56 = vpop.xlane.xlu0 %2599 }
 0xc03   :  { %4181 = vrcp.f32 %v2600_v56 }
 0xc04   :  { %v4176_v58 = vpop.eup %4175  ;;  %3960 = vmatmul.mubr.msk.f32.vlgmr.msra.gmra.mrb[26].mxu0 %vm256_vm6, %v2620_v42 }
 0xc05   :  { %v2619_v59 = vmul.f32 %v4176_v58, %v4160_v23  ;;  %3968 = vmatpush3.msra.mxu0 %v2931_v40  ;;  %v2609_v1 = vpop.xlane.xlu1 %2608  ;;  %3969 = vmatprep.mubr.msk.f32.mxu0 %vm4249_vm5, %v4248_v52 }
 0xc06   :  { %4183 = vrcp.f32 %v2609_v1  ;;  %v2606_v60 = vpop.xlane.xlu0 %2605  ;;  %3977 = vmatprep.subr.mxu0 %v4248_v52 }
 0xc07   :  { %4185 = vrcp.f32 %v2606_v60  ;;  %3955 = vmatmul.mubr.msk.f32.vlgmr.msra.gmra.mrb[32].mxu1 %vm256_vm6, %v2619_v59 }
 0xc08   :  { %v4178_v57 = vpop.eup %4177  ;;  %3963 = vmatpush3.msra.mxu1 %v2855_v46  ;;  %3964 = vmatprep.mubr.msk.f32.mxu1 %vm4249_vm5, %v4248_v52  ;;  %v4830_v46 = vld [vmem:[#allocation2] sm:$0xff] }
 0xc09   :  { %v2621_v3 = vmul.f32 %v4178_v57, %v4162_v29  ;;  %3972 = vmatprep.subr.mxu1 %v4248_v52  ;;  %v3159_v5 = vpop.permute.xlu1 %3158 }
 0xc0a   :  { %v3083_v6 = vpop.permute.xlu0 %3082 }
 0xc0b   :  { %3965 = vmatmul.mubr.msk.f32.vlgmr.msra.gmra.mrb[34].mxu1 %vm256_vm6, %v2621_v3 }
 0xc0c   :  { %v4180_v0 = vpop.eup %4179  ;;  %3973 = vmatpush3.msra.mxu1 %v3007_v7  ;;  %3974 = vmatprep.mubr.msk.f32.mxu1 %vm4249_vm5, %v4248_v52  ;;  %v3267_v7 = vrot.slane %v4830_v46, %v3266_v45 }
 0xc0d   :  { %v4182_v55 = vpop.eup %4181  ;;  %v2623_v54 = vmul.f32 %v4180_v0, %v4164_v11  ;;  %3982 = vmatprep.subr.mxu1 %v4248_v52 }
 0xc0e   :  { %v2622_v62 = vmul.f32 %v4182_v55, %v4166_v32 }
 0xc0f   :  { %3975 = vmatmul.mubr.msk.f32.vlgmr.msra.gmra.mrb[36].mxu1 %vm256_vm6, %v2623_v54 }
 0xc10   :  { %v4184_v38 = vpop.eup %4183  ;;  %3970 = vmatmul.mubr.msk.f32.vlgmr.msra.gmra.mrb[28].mxu0 %vm256_vm6, %v2622_v62  ;;  %3983 = vmatpush3.msra.mxu1 %v3159_v5  ;;  %v3403_v62 = vld [vmem:[%s4926_s7] sm:$0xff]  ;;  %v3404_v5 = vld [vmem:[%s4926_s7 + $0x8] sm:$0xff] }
 0xc11   :  { %v4186_v53 = vpop.eup %4185  ;;  %v2625_v8 = vmul.f32 %v4184_v38, %v4764_v35  ;;  %3978 = vmatpush3.msra.mxu0 %v3083_v6  ;;  %3979 = vmatprep.mubr.msk.f32.mxu0 %vm4249_vm5, %v4248_v52  ;;  %v3405_v38 = vld [vmem:[%s4926_s7 + $0x10] sm:$0xff]  ;;  %v4068_v6 = vpack.c.bf16 %v3404_v5, %v3403_v62 }
 0xc12   :  { %v2624_v63 = vmul.f32 %v4186_v53, %v4766_v36  ;;  %3984 = vmatprep.mubr.msk.f32.mxu1 %vm4249_vm5, %v4248_v52  ;;  %4061 = vmatprep.subr.bf16.mxu0 %v4060_v15  ;;  %v62_v52 = vld [vmem:[%s4925_s6 + $0x30] sm:$0xff]  ;;  %v3406_v53 = vld [vmem:[%s4926_s7 + $0x18] sm:$0xff] }
 0xc13   :  { %3985 = vmatmul.mubr.msk.f32.vlgmr.msra.gmra.mrb[38].mxu1 %vm256_vm6, %v2625_v8  ;;  %v4064_v20 = vpack.c.bf16 %v63_v18, %v62_v52  ;;  %v4072_v8 = vpack.c.bf16 %v3406_v53, %v3405_v38  ;;  %4069 = vmatprep.subr.bf16.mxu1 %v4068_v6 }
 0xc14   :  { %3980 = vmatmul.mubr.msk.f32.vlgmr.msra.gmra.mrb[30].mxu0 %vm256_vm6, %v2624_v63  ;;  %4071 = vmatpush3.bf16.msra.mxu1 %v4068_v6  ;;  %v3494_v63 = vld [vmem:[%s4927_s8] sm:$0xff] }
 0xc15   :  { %4063 = vmatpush3.bf16.msra.mxu0 %v4060_v15  ;;  %4073 = vmatprep.subr.bf16.mxu1 %v4072_v8  ;;  %v3498_v15 = vld [vmem:[%s4927_s8 + $0x20] sm:$0xff] }
 0xc16   :  { %4065 = vmatprep.subr.bf16.mxu0 %v4064_v20 }
 0xc18   :  { %4075 = vmatpush3.bf16.msra.mxu1 %v4072_v8 }
 0xc19   :  { %4067 = vmatpush3.bf16.msra.mxu0 %v4064_v20 }
 0xc81   :  { %v2698_v9 = vpop.f32.mrb[24].mxu0 }
 0xc82   :  { %v3951_v10 = vpop.f32.mrb[25].mxu0 }
 0xc83   :  { %v3496_v10 = vld [vmem:[%s4927_s8 + $0x10] sm:$0xff] }
 0xcd7   :  { %v2850_v14 = vpop.f32.mrb[26].mxu0 }
 0xcd8   :  { %v3961_v16 = vpop.f32.mrb[27].mxu0 }
 0xcd9   :  { %v3499_v16 = vld [vmem:[%s4927_s8 + $0x28] sm:$0xff] }
 0xcda   :  { %v2774_v17 = vpop.f32.mrb[32].mxu1 }
 0xcdb   :  { %v3956_v19 = vpop.f32.mrb[33].mxu1  ;;  %3236 = vrot.lane.b32.xlu0 %v2774_v17, %s4247_s24  ;;  %v4084_v17 = vpack.c.bf16 %v3499_v16, %v3498_v15 }
 0xcde   :  { %v2926_v21 = vpop.f32.mrb[34].mxu1 }
 0xcdf   :  { %v3966_v22 = vpop.f32.mrb[35].mxu1  ;;  %3244 = vrot.lane.b32.xlu0 %v2850_v14, %s4256_s0  ;;  %v4080_v14 = vpack.c.bf16 %v3497_v13, %v3496_v10 }
 0xce2   :  { %v3078_v23 = vpop.f32.mrb[36].mxu1 }
 0xce3   :  { %v3002_v24 = vpop.f32.mrb[28].mxu0  ;;  %3238 = vrot.lane.b32.xlu1 %v3078_v23, %s4247_s24  ;;  %v3976_v25 = vpop.f32.mrb[37].mxu1  ;;  %3252 = vrot.lane.b32.xlu0 %v2926_v21, %s4257_s9 }
 0xce4   :  { %v3971_v26 = vpop.f32.mrb[29].mxu0 }
 0xce6   :  { %v3230_v27 = vpop.f32.mrb[38].mxu1 }
 0xce7   :  { %v3154_v28 = vpop.f32.mrb[30].mxu0  ;;  %v3986_v29 = vpop.f32.mrb[39].mxu1 }
 0xce8   :  { %3246 = vrot.lane.b32.xlu1 %v3154_v28, %s4256_s0  ;;  %v3981_v31 = vpop.f32.mrb[31].mxu0 }
 0xcec   :  { %3254 = vrot.lane.b32.xlu1 %v3230_v27, %s4257_s9 }
 0xd4d   :  { %v3237_v11 = vpop.permute.xlu0 %3236 }
 0xd4e   :  { %v3258_v33 = vsel %vm256_vm6, %v2698_v9, %v3237_v11  ;;  %v3495_v9 = vld [vmem:[%s4927_s8 + $0x8] sm:$0xff] }
 0xd4f   :  { %v4076_v12 = vpack.c.bf16 %v3495_v9, %v3494_v63 }
 0xd51   :  { %v3245_v32 = vpop.permute.xlu0 %3244  ;;  %4077 = vmatprep.subr.bf16.mxu0 %v4076_v12 }
 0xd52   :  { %v3260_v34 = vsel %vm1585_vm8, %v3258_v33, %v3245_v32  ;;  %v4196_v33 = vld [vmem:[#allocation2 + $0x8] sm:$0x1f] }
 0xd55   :  { %v3239_v35 = vpop.permute.xlu1 %3238  ;;  %v3253_v36 = vpop.permute.xlu0 %3252 }
 0xd56   :  { %v3262_v37 = vsel %vm1588_vm9, %v3260_v34, %v3253_v36  ;;  %v3259_v40 = vsel %vm256_vm6, %v3002_v24, %v3239_v35  ;;  %v3388_v34 = vrot.slane %v4196_v33, %v1593_v61  ;;  %v3400_v35 = vrot.slane %v4196_v33, %v3266_v45  ;;  %v3500_v61 = vld [vmem:[%s4927_s8 + $0x30] sm:$0xff]  ;;  %v3501_v45 = vld [vmem:[%s4927_s8 + $0x38] sm:$0xff]  ;;  %s4259_s8 = smov [#allocation5]  }
 0xd57   :  { %3995 = vmatprep.mubr.msk.f32.mxu0 %vm96_vm0, %v3262_v37  ;;  %s3599_s15 = sshll.u32 %s4259_s8, 4  ;;  %s3600_s15 = int_to_ptr.vmem [resolvable:$true] %s3599_s15 }
 0xd58   :  { %s4219_s16 = scalar_lea.vmem %s3600_s15, 256  ;;  %p4224_p9 = scmp.lt.s32.totalorder %s3600_s15, %s3600_s15 }
 0xd59   :  { %p4220_p8 = scmp.ne.s32.totalorder %s3600_s15, %s4219_s16  ;;  %p4225_p10 = scmp.lt.s32.totalorder %s4219_s16, %s4219_s16 }
 0xd5a   :  { %v3247_v39 = vpop.permute.xlu1 %3246 }
 0xd5b   :  { %v3261_v2 = vsel %vm1585_vm8, %v3259_v40, %v3247_v39  ;;  %p4226_p11 = por %p4225_p10, %p4224_p9 }
 0xd5d   :  { %p4227_p12 = pnand %p4226_p11, %p4220_p8 }
 0xd5e   :  { %v3255_v43 = vpop.permute.xlu1 %3254 }
 0xd5f   :  { %v3263_v44 = vsel %vm1588_vm9, %v3261_v2, %v3255_v43 }
 0xd60   :  { %3996 = vmatmul.mubr.msk.f32.vlgmr.msra.gmra.mrb[32].mxu0 %vm96_vm0, %v3263_v44 }
 0xd61   :  { %4079 = vmatpush3.bf16.msra.mxu0 %v4076_v12 }
 0xd62   :  { %4081 = vmatprep.subr.bf16.mxu0 %v4080_v14 }
 0xd65   :  { %4083 = vmatpush3.bf16.msra.mxu0 %v4080_v14 }
 0xd66   :  { %4085 = vmatprep.subr.bf16.mxu0 %v4084_v17 }
 0xd69   :  { %4087 = vmatpush3.bf16.msra.mxu0 %v4084_v17 }
 0xe33   :  { %v3997_v47 = vpop.f32.mrb[32].mxu0 }
 0xe34   :  { %v3346_v4 = vadd.f32 %v3997_v47, %v3267_v7  ;;  %v3340_v48 = vpop.f32.mrb[33].mxu0  ;;  %v4088_v47 = vpack.c.bf16 %v3501_v45, %v3500_v61 }
 0xe35   :  { %v3341_v51 = vadd.f32 %v3340_v48, %v3267_v7 }
 0xe36   :  { %v4836_v41 = vadd.f32 %v3346_v4, %v4580_v49  ;;  %4089 = vmatprep.subr.bf16.mxu0 %v4088_v47  ;;  %v3409_v4 = vsub.s32 5, %v4361_v30 }
 0xe37   :  { %v4839_v42 = vadd.f32 %v3341_v51, %v4583_v50  ;;  %4091 = vmatpush3.bf16.msra.mxu0 %v4088_v47 }
 0xe38   :  { %v3354_v56 = vsel %vm96_vm0, %v4836_v41, 0.0  ;;  %v3410_v48 = vrot.slane %v4830_v46, %v3409_v4 }
 0xe39   :  { %3355 = vadd.xlane.f32.xlu1 %v3354_v56  ;;  %v3351_v58 = vsel %vm96_vm0, %v4839_v42, 0.0 }
 0xe3a   :  { %3352 = vadd.xlane.f32.xlu0 %v3351_v58 }
 0xec6   :  { %v3356_v59 = vpop.xlane.xlu1 %3355 }
 0xec7   :  { %v3358_v1 = vmul.f32 0.03125, %v3356_v59  ;;  %v3353_v60 = vpop.xlane.xlu0 %3352 }
 0xec8   :  { %v3357_v57 = vmul.f32 0.03125, %v3353_v60 }
 0xec9   :  { %v4846_v3 = vsub.f32 %v4836_v41, %v3358_v1 }
 0xeca   :  { %v3359_v49 = vsub.f32 %v4839_v42, %v3357_v57  ;;  %v3588_v57 = vsub.s32 6, %v4361_v30 }
 0xecb   :  { %v3362_v55 = vmul.f32 %v4846_v3, %v4846_v3  ;;  %v3390_v40 = vmul.f32 %v3388_v34, %v4846_v3 }
 0xecc   :  { %v3361_v0 = vmul.f32 %v3359_v49, %v3359_v49  ;;  %v3389_v36 = vmul.f32 %v3388_v34, %v3359_v49  ;;  %v3589_v3 = vrot.slane %v4830_v46, %v3588_v57 }
 0xecd   :  { %v3366_v54 = vsel %vm96_vm0, %v3362_v55, 0.0 }
 0xece   :  { %v3363_v50 = vsel %vm96_vm0, %v3361_v0, 0.0 }
 0xecf   :  { %3364 = vadd.xlane.f32.xlu0 %v3363_v50 }
 0xed3   :  { %3367 = vadd.xlane.f32.xlu0 %v3366_v54 }
 0xf5c   :  { %v3365_v52 = vpop.xlane.xlu0 %3364 }
 0xf5d   :  { %v3369_v18 = vmul.f32 0.032258064, %v3365_v52 }
 0xf5f   :  { %4187 = vrsqrt.f32 %v3369_v18  ;;  %vm3373_vm15 = vcmp.eq.f32.partialorder %v3369_v18, inf  ;;  %v3376_v23 = vand.u32 2147483648, %v3369_v18  ;;  %vm3375_vm1 = vcmp.eq.f32.partialorder %v3369_v18, 0.0 }
 0xf60   :  { %v3368_v19 = vpop.xlane.xlu0 %3367 }
 0xf61   :  { %v3370_v20 = vmul.f32 0.032258064, %v3368_v19 }
 0xf63   :  { %4189 = vrsqrt.f32 %v3370_v20  ;;  %vm3380_vm2 = vcmp.eq.f32.partialorder %v3370_v20, inf  ;;  %v3383_v29 = vand.u32 2147483648, %v3370_v20  ;;  %vm3382_vm3 = vcmp.eq.f32.partialorder %v3370_v20, 0.0 }
 0xf69   :  { %v4188_v21 = vpop.eup %4187 }
 0xf6a   :  { %v3372_v22 = vmul.f32 %v4188_v21, %v3369_v18 }
 0xf6c   :  { %v3374_v24 = vsel %vm3373_vm15, %v3369_v18, %v3372_v22 }
 0xf6d   :  { %v4190_v25 = vpop.eup %4189  ;;  %v3377_v26 = vsel %vm3375_vm1, %v3376_v23, %v3374_v24 }
 0xf6e   :  { %v3379_v27 = vmul.f32 %v4190_v25, %v3370_v20  ;;  %v3391_v28 = vadd.f32 1e-06, %v3377_v26 }
 0xf70   :  { %v3381_v31 = vsel %vm3380_vm2, %v3370_v20, %v3379_v27  ;;  %4191 = vrcp.f32 %v3391_v28 }
 0xf71   :  { %v3384_v11 = vsel %vm3382_vm3, %v3383_v29, %v3381_v31 }
 0xf72   :  { %v3392_v32 = vadd.f32 1e-06, %v3384_v11 }
 0xf74   :  { %4193 = vrcp.f32 %v3392_v32 }
 0xf7a   :  { %v4192_v37 = vpop.eup %4191 }
 0xf7b   :  { %v3394_v39 = vmul.f32 %v4192_v37, %v3389_v36 }
 0xf7d   :  { %v3401_v2 = vadd.f32 %v3400_v35, %v3394_v39 }
 0xf7e   :  { %v4194_v43 = vpop.eup %4193 }
 0xf7f   :  { %4006 = vmatprep.mubr.msk.f32.mxu1 %vm96_vm0, %v3401_v2  ;;  %v3396_v44 = vmul.f32 %v4194_v43, %v3390_v40 }
 0xf81   :  { %v3402_v7 = vadd.f32 %v3400_v35, %v3396_v44 }
 0xf83   :  { %4007 = vmatmul.mubr.msk.f32.vlgmr.msra.gmra.mrb[40].mxu1 %vm96_vm0, %v3402_v7 }
0x1056   :  { %v4008_v51 = vpop.f32.mrb[40].mxu1 }
0x1057   :  { %v3489_v56 = vadd.f32 %v4008_v51, %v3410_v48  ;;  %v3483_v58 = vpop.f32.mrb[41].mxu1 }
0x1058   :  { %v3484_v59 = vadd.f32 %v3483_v58, %v3410_v48 }
0x1059   :  { %v3493_v60 = vmax.f32 %v3489_v56, 0.0 }
0x105a   :  { %v3492_v1 = vmax.f32 %v3484_v59, 0.0 }
0x105c   :  { %4025 = vmatprep.mubr.msk.f32.mxu0 %vm3502_vm4, %v3492_v1 }
0x105d   :  { %4026 = vmatmul.mubr.msk.f32.vlgmr.msra.gmra.mrb[34].mxu0 %vm3502_vm4, %v3493_v60 }
0x1130   :  { %v4027_v49 = vpop.f32.mrb[34].mxu0 }
0x1131   :  { %v3585_v0 = vadd.f32 %v4027_v49, %v4836_v41  ;;  %v3575_v50 = vpop.f32.mrb[35].mxu0 }
0x1132   :  { %v3584_v55 = vadd.f32 %v3575_v50, %v4839_v42 }
0x1133   :  { %v3591_v54 = vadd.f32 %v3589_v3, %v3585_v0 }
0x1134   :  { %v3590_v62 = vadd.f32 %v3589_v3, %v3584_v55 }
0x1135   :  { %3593 = vst.msk [vmem:[#allocation5 + $0x8] sm:$0xff] %vm96_vm0, %v3591_v54 }
0x1136   :  { %3592 = vst.msk [vmem:[#allocation5] sm:$0xff] %vm96_vm0, %v3590_v62 }
0x1137   :  { %4230 = shalt.err (!%p4227_p12)
}
0x1138   :  { %s4231_s0 = scalar_lea.hbm %s4929_s10, 256 }
0x1139   :  { %p4232_p13 = scmp.ne.s32.totalorder %s4929_s10, %s4231_s0  ;;  %p4235_p0 = scmp.lt.u32.totalorder %s4231_s0, %s4929_s10 }
0x113b   :  { %p4237_p1 = pnand %p4235_p0, %p4232_p13 }
0x113d   :  { %4240 = shalt.err (!%p4237_p1)
}
0x113e   :  { %3605 = dma.vmem_to_hbm [thread:$0]  %s3600_s15, 256, %s4929_s10, [#allocation4], %s4246_s23, %s4246_s23, %s4247_s24  }
0x113f   :  { %4243 = dma.done.wait [#allocation4], 256  }
0x1140   :  { %4244 = vsyncadd [#allocation4], 4294967040 }
0x1141   :  { %3609 = vsyncpa [#allocation3], 1 }
0x1142   :  { %3610 = vsyncpa [#allocation4], 1 }

</bundles_post_ra>
